<compile_context>
chip_gen: v6e
topology: v6e:2x2x1
jax: 0.10.0
libtpu: 0.0.40
codegen_flags: <defaults>
</compile_context>

<pallas_src>
import functools

import jax
import jax.numpy as jnp
import numpy as np
from jax.experimental import pallas as pl
from jax.experimental.pallas import tpu as pltpu

KERNEL_SET = (2, 3, 6, 7)


def _round_up(v, m):
    return -(-int(v) // int(m)) * int(m)


# ----------------------------------------------------------------------------
# Kernel
# ----------------------------------------------------------------------------
def _dilated_inception_kernel(x_ref, w_ref, b_ref, o_ref, xs_ref, *,
                              dilation, t_out, kmax):
    """One grid step over a tile of M = N*V rows.

    x_ref : (tm, T, C_in)           VMEM input tile
    w_ref : (kmax*C_in, C_out_pad)  VMEM fused im2col weight (zero-padded taps)
    b_ref : (1, C_out_pad)          VMEM fused bias (f32)
    o_ref : (tm*t_out, C_out_pad)   VMEM lane-dense output tile
    xs_ref: (tm*t_out, kmax*C_in)   VMEM scratch holding the im2col LHS
    """
    x = x_ref[...]                                   # (tm, T, cin)
    tm, _, cin = x.shape

    # Build the im2col LHS: column block p holds the input window shifted by
    # p*dilation.  Static-offset ref stores; leading-dim-merge reshapes only.
    for p in range(kmax):                            # static unroll (kmax = 7)
        lo = p * dilation
        xs_ref[:, p * cin:(p + 1) * cin] = (
            x[:, lo:lo + t_out, :].reshape(tm * t_out, cin))

    # Single MXU matmul with K = kmax*C_in, f32 accumulation.
    acc = jax.lax.dot_general(
        xs_ref[...], w_ref[...],
        dimension_numbers=(((1,), (0,)), ((), ())),
        preferred_element_type=jnp.float32)          # (tm*t_out, cout_pad)
    acc = acc + b_ref[...]                           # fused bias, added once
    o_ref[...] = acc.astype(o_ref.dtype)             # lane-dense (128k) store


# ----------------------------------------------------------------------------
# Tiling heuristics
# ----------------------------------------------------------------------------
def _tile_vmem_bytes(tm, T, cin, t_out, cout_pad, kmax, x_isz, o_isz):
    """Conservative per-step VMEM estimate: (8,128) layout padding of the
    double-buffered pipeline tiles + im2col scratch + f32 accumulator."""
    rows_out = _round_up(tm * t_out, 8)
    x_tile = tm * _round_up(T, 8) * _round_up(cin, 128) * x_isz
    o_tile = rows_out * cout_pad * o_isz
    w_tile = _round_up(kmax * cin, 8) * cout_pad * x_isz
    b_tile = 8 * cout_pad * 4
    xs_scr = rows_out * _round_up(kmax * cin, 128) * x_isz
    acc_tmp = rows_out * cout_pad * 4
    return 2 * (x_tile + o_tile + w_tile + b_tile) + 2 * xs_scr + acc_tmp


def _vmem_budget_and_limit():
    """Generation-aware tile budget + explicit Mosaic vmem_limit_bytes.
    Falls back to the smallest physical VMEM (v7x: 64 MiB) when unknown."""
    phys = 64 << 20
    try:
        get_info = getattr(pltpu, "get_tpu_info", None)
        if get_info is not None:
            cap = getattr(get_info(), "vmem_capacity_bytes", None)
            if cap:
                phys = int(cap)
    except Exception:
        pass
    budget = min(int(phys * 0.40), 52 << 20)
    limit = min(int(phys * 0.75), 100 << 20)
    return budget, limit


def _choose_tm(M, vmem_of_tm, vmem_budget, min_grid=4):
    """Largest multiple-of-8 divisor of M that fits the budget, preferring
    >= min_grid steps so pipelining (and v7x's 2 TCs) have work to overlap."""
    divisors = [d for d in range(8, M + 1, 8) if M % d == 0]
    if not divisors:
        return max(M, 1)
    fitting = [d for d in divisors if vmem_of_tm(d) <= vmem_budget]
    if not fitting:
        return divisors[0]
    preferred = [d for d in fitting if M // d >= min_grid]
    return max(preferred) if preferred else max(fitting)


# ----------------------------------------------------------------------------
# Wrapper
# ----------------------------------------------------------------------------
def dilated_inception_forward(x_nchw, weights, biases, dilation=2,
                              use_bf16=True):
    """Forward pass of dilated_inception.

    x_nchw     : (N, C_in, V, T) activations.
    weights[i] : (k_i, C_in, C_out_k) sampled conv weights, k_i in KERNEL_SET.
    biases[i]  : (C_out_k,) sampled biases.
    Returns (N, 4*C_out_k, V, T - dilation*6), matching the PyTorch module.
    """
    N, Cin, V, T = x_nchw.shape
    kmax = max(KERNEL_SET)
    t_out = T - dilation * (kmax - 1)
    if t_out <= 0:
        raise ValueError("sequence too short for the k=7 dilated branch")

    co = weights[0].shape[-1]
    assert all(w.shape[-1] == co for w in weights)
    assert all(b.shape[-1] == co for b in biases)
    cout_total = co * len(KERNEL_SET)
    cout_pad = _round_up(cout_total, 128)          # lane-dense output width

    out_dtype = x_nchw.dtype
    compute_dtype = jnp.bfloat16 if use_bf16 else x_nchw.dtype

    # --- Fuse the 4 branches into one zero-padded im2col weight + bias. -----
    # Branch `kern`'s tap j lands at fused tap p = (kmax - kern) + j, which
    # reproduces PyTorch's "truncate to the k=7 output length" exactly.
    padded = [jnp.pad(w, ((kmax - w.shape[0], 0), (0, 0), (0, 0)))
              for w in weights]
    w_fused = jnp.concatenate(padded, axis=-1)             # (kmax, Cin, cout_total)
    w_fused = jnp.pad(w_fused, ((0, 0), (0, 0), (0, cout_pad - cout_total)))
    w2d = w_fused.reshape(kmax * Cin, cout_pad).astype(compute_dtype)
    b2d = jnp.pad(jnp.concatenate(biases, axis=0),
                  (0, cout_pad - cout_total)).astype(jnp.float32)[None, :]

    # --- NCHW -> (M, T, C_in); bf16 I/O cast done in the wrapper. -----------
    # TODO(synk): fuse this HBM transpose (and the output one) into the kernel
    # by BlockSpec'ing directly over the NCHW array with a per-tile transpose.
    x = jnp.transpose(x_nchw, (0, 2, 3, 1)).reshape(N * V, T, Cin)
    x = x.astype(compute_dtype)
    M = N * V
    pad_rows = (-M) % 8
    if pad_rows:                                   # keep tm a multiple of 8
        x = jnp.pad(x, ((0, pad_rows), (0, 0), (0, 0)))
    Mp = M + pad_rows

    x_isz = jnp.dtype(compute_dtype).itemsize
    o_isz = jnp.dtype(out_dtype).itemsize
    vmem_budget, vmem_limit = _vmem_budget_and_limit()
    tm = _choose_tm(
        Mp,
        lambda d: _tile_vmem_bytes(d, T, Cin, t_out, cout_pad, kmax,
                                   x_isz, o_isz),
        vmem_budget)
    grid = (Mp // tm,)

    kernel = functools.partial(_dilated_inception_kernel, dilation=dilation,
                               t_out=t_out, kmax=kmax)

    cost = pl.CostEstimate(
        flops=2 * Mp * t_out * Cin * co * sum(KERNEL_SET),  # non-zero taps only
        transcendentals=0,
        bytes_accessed=(Mp * T * Cin * x_isz
                        + kmax * Cin * cout_pad * x_isz
                        + cout_pad * 4
                        + Mp * t_out * cout_pad * o_isz))

    out2d = pl.pallas_call(
        kernel,
        out_shape=jax.ShapeDtypeStruct((Mp * t_out, cout_pad), out_dtype),
        grid=grid,
        in_specs=[
            pl.BlockSpec((tm, T, Cin), lambda i: (i, 0, 0)),
            pl.BlockSpec((kmax * Cin, cout_pad), lambda i: (0, 0)),
            pl.BlockSpec((1, cout_pad), lambda i: (0, 0)),
        ],
        out_specs=pl.BlockSpec((tm * t_out, cout_pad), lambda i: (i, 0)),
        scratch_shapes=[pltpu.VMEM((tm * t_out, kmax * Cin), compute_dtype)],
        compiler_params=pltpu.CompilerParams(
            dimension_semantics=("parallel",),
            vmem_limit_bytes=vmem_limit),
        cost_estimate=cost,
    )(x, w2d, b2d)

    out = out2d[:M * t_out, :cout_total].reshape(N, V, t_out, cout_total)
    return jnp.transpose(out, (0, 3, 1, 2))    # NCHW: (N, 4*C_out_k, V, t_out)


# ----------------------------------------------------------------------------
# Pure-JAX reference + parameter construction
# ----------------------------------------------------------------------------
def _reference_forward(x_nchw, weights, biases, dilation=2):
    """Pure-JAX reference mirroring the PyTorch module."""
    outs = []
    for w, bb in zip(weights, biases):
        # (k, C_in, C_out_k) -> OIHW (C_out_k, C_in, 1, k)
        w_oihw = jnp.transpose(w, (2, 1, 0))[:, :, None, :]
        y = jax.lax.conv_general_dilated(
            x_nchw, w_oihw, window_strides=(1, 1), padding="VALID",
            rhs_dilation=(1, dilation),
            dimension_numbers=("NCHW", "OIHW", "NCHW"))
        y = y + bb[None, :, None, None]
        outs.append(y)
    t_out = outs[-1].shape[-1]
    outs = [o[..., -t_out:] for o in outs]
    return jnp.concatenate(outs, axis=1)


def make_bayes_params(key, cin, cout_total, prior_mu=0.0, prior_sigma=0.1):
    """Deterministically 'sample' BayesConv2d weights: w = mu + sigma * eps."""
    co = cout_total // len(KERNEL_SET)
    weights, biases = [], []
    for kern in KERNEL_SET:
        key, k_mu, k_eps, k_b = jax.random.split(key, 4)
        mu = prior_mu + 0.1 * jax.random.normal(k_mu, (kern, cin, co),
                                                jnp.float32)
        eps = jax.random.normal(k_eps, (kern, cin, co), jnp.float32)
        w = mu + prior_sigma * eps          # one deterministic posterior draw
        bias = 0.05 * jax.random.normal(k_b, (co,), jnp.float32)
        weights.append(w)
        biases.append(bias)
    return weights, biases


if __name__ == "__main__":
    key = jax.random.PRNGKey(0)
    k_x, k_p = jax.random.split(key)

    N, CIN, V, T = 2, 4, 16, 19          # T_out = 19 - 2*(7-1) = 7
    COUT_TOTAL = 32                      # 8 output channels per branch
    DILATION = 2

    x = jax.random.normal(k_x, (N, CIN, V, T), jnp.float32)
    weights, biases = make_bayes_params(k_p, CIN, COUT_TOTAL)

    ref = jax.block_until_ready(
        _reference_forward(x, weights, biases, dilation=DILATION))

    # f32 path: tight comparison against the conv reference.
    out_f32 = jax.block_until_ready(
        dilated_inception_forward(x, weights, biases, dilation=DILATION,
                                  use_bf16=False))
    t_out = T - DILATION * (max(KERNEL_SET) - 1)
    assert out_f32.shape == (N, COUT_TOTAL, V, t_out), out_f32.shape
    np.testing.assert_allclose(np.asarray(out_f32), np.asarray(ref),
                               rtol=2e-5, atol=2e-5)

    # bf16 perf path (wrapper-side cast, f32 accumulation): looser tolerance.
    out_bf16 = jax.block_until_ready(
        dilated_inception_forward(x, weights, biases, dilation=DILATION,
                                  use_bf16=True))
    assert out_bf16.shape == (N, COUT_TOTAL, V, t_out), out_bf16.shape
    np.testing.assert_allclose(np.asarray(out_bf16), np.asarray(ref),
                               rtol=5e-2, atol=5e-2)

    print("KERNEL_OK")
</pallas_src>

<mosaic_0001>
module attributes {stable_mosaic.version = 11 : i64} {
  func.func @_dilated_inception_kernel(%arg0: i32, %arg1: memref<8x19x4xf32, #tpu.memory_space<vmem>>, %arg2: memref<28x128xf32, #tpu.memory_space<vmem>>, %arg3: memref<1x128xf32, #tpu.memory_space<vmem>>, %arg4: memref<56x128xf32, #tpu.memory_space<vmem>>, %arg5: memref<56x28xf32, #tpu.memory_space<vmem>>) attributes {dimension_semantics = [#tpu.dimension_semantics<parallel>], iteration_bounds = array<i64: 4>, scalar_prefetch = 0 : i64, scratch_operands = 1 : i64, tpu.core_type = #tpu.core_type<tc>, window_params = [{transform_indices = @transform_0, window_bounds = array<i64: 8, 19, 4>}, {pipeline_mode = #tpu.pipeline_mode<synchronous>, transform_indices = @transform_1, window_bounds = array<i64: 28, 128>}, {pipeline_mode = #tpu.pipeline_mode<synchronous>, transform_indices = @transform_2, window_bounds = array<i64: 1, 128>}, {transform_indices = @transform_3, window_bounds = array<i64: 56, 128>}]} {
    %c0 = arith.constant 0 : index
    %c0_0 = arith.constant 0 : index
    %c0_1 = arith.constant 0 : index
    %0 = vector.load %arg1[%c0, %c0_0, %c0_1] : memref<8x19x4xf32, #tpu.memory_space<vmem>>, vector<8x19x4xf32>
    %1 = vector.extract_strided_slice %0 {offsets = [0, 0, 0], sizes = [8, 7, 4], strides = [1, 1, 1]} : vector<8x19x4xf32> to vector<8x7x4xf32>
    %2 = vector.shape_cast %1 : vector<8x7x4xf32> to vector<56x4xf32>
    %c0_2 = arith.constant 0 : index
    %c0_3 = arith.constant 0 : index
    %3 = vector.load %arg5[%c0_2, %c0_3] : memref<56x28xf32, #tpu.memory_space<vmem>>, vector<56x4xf32>
    tpu.vector_store %arg5[%c0_2, %c0_3], %2 {strides = array<i32>} : memref<56x28xf32, #tpu.memory_space<vmem>>, vector<56x4xf32>,
    %4 = vector.extract_strided_slice %0 {offsets = [0, 2, 0], sizes = [8, 7, 4], strides = [1, 1, 1]} : vector<8x19x4xf32> to vector<8x7x4xf32>
    %5 = vector.shape_cast %4 : vector<8x7x4xf32> to vector<56x4xf32>
    %c0_4 = arith.constant 0 : index
    %c4 = arith.constant 4 : index
    %6 = vector.load %arg5[%c0_4, %c4] : memref<56x28xf32, #tpu.memory_space<vmem>>, vector<56x4xf32>
    tpu.vector_store %arg5[%c0_4, %c4], %5 {strides = array<i32>} : memref<56x28xf32, #tpu.memory_space<vmem>>, vector<56x4xf32>,
    %7 = vector.extract_strided_slice %0 {offsets = [0, 4, 0], sizes = [8, 7, 4], strides = [1, 1, 1]} : vector<8x19x4xf32> to vector<8x7x4xf32>
    %8 = vector.shape_cast %7 : vector<8x7x4xf32> to vector<56x4xf32>
    %c0_5 = arith.constant 0 : index
    %c8 = arith.constant 8 : index
    %9 = vector.load %arg5[%c0_5, %c8] : memref<56x28xf32, #tpu.memory_space<vmem>>, vector<56x4xf32>
    tpu.vector_store %arg5[%c0_5, %c8], %8 {strides = array<i32>} : memref<56x28xf32, #tpu.memory_space<vmem>>, vector<56x4xf32>,
    %10 = vector.extract_strided_slice %0 {offsets = [0, 6, 0], sizes = [8, 7, 4], strides = [1, 1, 1]} : vector<8x19x4xf32> to vector<8x7x4xf32>
    %11 = vector.shape_cast %10 : vector<8x7x4xf32> to vector<56x4xf32>
    %c0_6 = arith.constant 0 : index
    %c12 = arith.constant 12 : index
    %12 = vector.load %arg5[%c0_6, %c12] : memref<56x28xf32, #tpu.memory_space<vmem>>, vector<56x4xf32>
    tpu.vector_store %arg5[%c0_6, %c12], %11 {strides = array<i32>} : memref<56x28xf32, #tpu.memory_space<vmem>>, vector<56x4xf32>,
    %13 = vector.extract_strided_slice %0 {offsets = [0, 8, 0], sizes = [8, 7, 4], strides = [1, 1, 1]} : vector<8x19x4xf32> to vector<8x7x4xf32>
    %14 = vector.shape_cast %13 : vector<8x7x4xf32> to vector<56x4xf32>
    %c0_7 = arith.constant 0 : index
    %c16 = arith.constant 16 : index
    %15 = vector.load %arg5[%c0_7, %c16] : memref<56x28xf32, #tpu.memory_space<vmem>>, vector<56x4xf32>
    tpu.vector_store %arg5[%c0_7, %c16], %14 {strides = array<i32>} : memref<56x28xf32, #tpu.memory_space<vmem>>, vector<56x4xf32>,
    %16 = vector.extract_strided_slice %0 {offsets = [0, 10, 0], sizes = [8, 7, 4], strides = [1, 1, 1]} : vector<8x19x4xf32> to vector<8x7x4xf32>
    %17 = vector.shape_cast %16 : vector<8x7x4xf32> to vector<56x4xf32>
    %c0_8 = arith.constant 0 : index
    %c20 = arith.constant 20 : index
    %18 = vector.load %arg5[%c0_8, %c20] : memref<56x28xf32, #tpu.memory_space<vmem>>, vector<56x4xf32>
    tpu.vector_store %arg5[%c0_8, %c20], %17 {strides = array<i32>} : memref<56x28xf32, #tpu.memory_space<vmem>>, vector<56x4xf32>,
    %19 = vector.extract_strided_slice %0 {offsets = [0, 12, 0], sizes = [8, 7, 4], strides = [1, 1, 1]} : vector<8x19x4xf32> to vector<8x7x4xf32>
    %20 = vector.shape_cast %19 : vector<8x7x4xf32> to vector<56x4xf32>
    %c0_9 = arith.constant 0 : index
    %c24 = arith.constant 24 : index
    %21 = vector.load %arg5[%c0_9, %c24] : memref<56x28xf32, #tpu.memory_space<vmem>>, vector<56x4xf32>
    tpu.vector_store %arg5[%c0_9, %c24], %20 {strides = array<i32>} : memref<56x28xf32, #tpu.memory_space<vmem>>, vector<56x4xf32>,
    %c0_10 = arith.constant 0 : index
    %c0_11 = arith.constant 0 : index
    %22 = vector.load %arg5[%c0_10, %c0_11] : memref<56x28xf32, #tpu.memory_space<vmem>>, vector<56x28xf32>
    %c0_12 = arith.constant 0 : index
    %c0_13 = arith.constant 0 : index
    %23 = vector.load %arg2[%c0_12, %c0_13] : memref<28x128xf32, #tpu.memory_space<vmem>>, vector<28x128xf32>
    %cst = arith.constant dense<0.000000e+00> : vector<56x128xf32>
    %24 = tpu.matmul %22, %23, %cst {dimension_numbers = #tpu.dot_dimension_numbers<[1], [0], [0], [1], [0, 0, 1, 1], [], []>} : vector<56x28xf32>, vector<28x128xf32>, vector<56x128xf32> -> vector<56x128xf32>
    %c0_14 = arith.constant 0 : index
    %c0_15 = arith.constant 0 : index
    %25 = vector.load %arg3[%c0_14, %c0_15] : memref<1x128xf32, #tpu.memory_space<vmem>>, vector<1x128xf32>
    %26 = vector.broadcast %25 : vector<1x128xf32> to vector<56x128xf32>
    %27 = arith.addf %24, %26 : vector<56x128xf32>
    %c0_16 = arith.constant 0 : index
    %c0_17 = arith.constant 0 : index
    %28 = vector.load %arg4[%c0_16, %c0_17] : memref<56x128xf32, #tpu.memory_space<vmem>>, vector<56x128xf32>
    tpu.vector_store %arg4[%c0_16, %c0_17], %27 {strides = array<i32>} : memref<56x128xf32, #tpu.memory_space<vmem>>, vector<56x128xf32>,
    return
  }
  func.func @transform_0(%arg0: i32) -> (i32, i32, i32) {
    %c0_i32 = arith.constant 0 : i32
    %c0_i32_0 = arith.constant 0 : i32
    %c0_i32_1 = arith.constant 0 : i32
    return %arg0, %c0_i32, %c0_i32_0 : i32, i32, i32
  }
  func.func @transform_1(%arg0: i32) -> (i32, i32) {
    %c0_i32 = arith.constant 0 : i32
    %c0_i32_0 = arith.constant 0 : i32
    %c0_i32_1 = arith.constant 0 : i32
    return %c0_i32, %c0_i32_0 : i32, i32
  }
  func.func @transform_2(%arg0: i32) -> (i32, i32) {
    %c0_i32 = arith.constant 0 : i32
    %c0_i32_0 = arith.constant 0 : i32
    %c0_i32_1 = arith.constant 0 : i32
    return %c0_i32, %c0_i32_0 : i32, i32
  }
  func.func @transform_3(%arg0: i32) -> (i32, i32) {
    %c0_i32 = arith.constant 0 : i32
    %c0_i32_0 = arith.constant 0 : i32
    return %arg0, %c0_i32 : i32, i32
  }
}

</mosaic_0001>

<bundles_post_ra>
// kernel: tpu_custom_call.1
= control target key start
LH: loop header
LB: loop body
LE: loop exit
PB: predicated region body
PF: predicated region fallthrough
CT: control target
= control target key end

     0   :  { %8 = vsyncpa [#allocation4], 0  ;;  %s4720_s0 = inlined_call_operand.vmem [shape: f32[32,19,4], index: 0, kind: input, shape index: {}]   ;;  %s4721_s1 = inlined_call_operand.vmem [shape: f32[28,128], index: 1, kind: input, shape index: {}]   ;;  %s4722_s2 = inlined_call_operand.vmem [shape: f32[1,128], index: 2, kind: input, shape index: {}]   ;;  %s4723_s3 = inlined_call_operand.hbm [shape: f32[224,128], index: 3, kind: output, shape index: {}]  }
   0x1   :  { %10 = vsyncpa [#allocation4 + $0x1], 0  ;;  %s3491_s12 = smov 0   ;;  %s3493_s13 = smov 0  }
   0x2   :  { %s3495_s14 = smov 0   ;;  %s3497_s15 = smov 0  }
   0x3 LB: > { %s3512_s16 = sadd.s32 4294967295, %s3458_s15   ;;  %s3240_s17 = sadd.s32 4294967294, %s3458_s15   ;;  %s3458_s15 = sphi %s3497_s15, %s4791_s15   ;;  %s3454_s14 = sphi %s3495_s14, %s4790_s14   ;;  %s3450_s13 = sphi %s3493_s13, %s4789_s13   ;;  %s3446_s12 = sphi %s3491_s12, %s4788_s12  }
   0x4   : > { %s3516_s18 = sadd.s32 1, %s3458_s15   ;;  %s91_s19 = sadd.s32 1, %s3454_s14 }
   0x5   : > { %s88_s20 = ssub.s32 %s3458_s15, %s3516_s18  ;;  %p101_p0 = scmp.ne.s32.totalorder %s3454_s14, %s3450_s13 }
   0x6   : > { %p89_p1 = scmp.eq.s32.totalorder %s88_s20, 0  ;;  %p102_p2 = scmp.eq.s32.totalorder %s3512_s16, 3 }
   0x7   : > { %p107_p3 = scmp.ne.s32.totalorder %s3450_s13, %s3446_s12  ;;  %p108_p4 = scmp.eq.s32.totalorder %s3240_s17, 3 }
   0x8   : > { %s3527_s21 = scalar_select %p89_p1, %s3454_s14, %s91_s19  }
   0x9   : > { %p3529_p5 = por %p102_p2, %p101_p0  ;;  %p3533_p6 = por %p108_p4, %p107_p3 }
   0xa   : > { %p3243_p7 = scmp.ge.s32.totalorder %s3458_s15, 1  ;;  %p142_p8 = scmp.lt.s32.totalorder %s3458_s15, 5 }
   0xc   : > { %p143_p9 = pnand %p3243_p7, %p142_p8 }
   0xe   : > { %146 = sbr.rel (%p143_p9) target bundleno = 520 (0x208), region = 32 }
  0x13   : > { %s3244_s24 = sshll.u32 %s3512_s16, 3  ;;  %v211_v0 = vlaneseq  ;;  %v3460_v1 = vmov 1966171168   ;;  %s3461_s29 = smov 12   ;;  %vm941_vm0 = vcmask 31744   ;;  %vm1313_vm1 = vcmask 64544  }
  0x14   : > { %p168_p10 = scmp.lt.s32.totalorder %s3244_s24, 31  ;;  %v209_v2 = vunpack.c.l.s4 %v3460_v1  ;;  %s3462_s30 = smov 4   ;;  %vm1629_vm2 = vcmask 97344   ;;  %vm3053_vm3 = vcmask 1043456   ;;  %vm2001_vm4 = vcmask 130144  }
  0x15   : > { %v212_v3 = vshrl.u32 %v211_v0, 7  ;;  %s3463_s4 = smov 16   ;;  %s3464_s5 = smov 8   ;;  %vm3468_vm5 = vmmov 0   ;;  %vm2317_vm6 = vcmask 162944   ;;  %vm2689_vm7 = vcmask 195744  }
  0x16   : > { %s4793_s24 = smov (!%p168_p10, %s3244_s24), 31  ;;  %v210_v4 = vunpack.c.0.s8 %v209_v2  ;;  %s3465_s6 = smov 20   ;;  %vm3005_vm8 = vcmask 228544   ;;  %vm3031_vm9 = vcmask 228352  }
  0x17   : > { %s3332_s25 = smul.u32 24, %s4793_s24  ;;  %s3466_s7 = smov 24  }
  0x18   : > { %v3540_v5 = vsub.s32 %v210_v4, %v212_v3  ;;  %s3469_s10 = smov [#allocation3]  }
  0x19   : > { %s3545_s28 = scalar_lea.vmem %s4720_s0, %s3332_s25  ;;  %s164_s25 = sand.u32 1, %s3450_s13  }
  0x1a   : > { %v175_v6 = vld [vmem:[%s3545_s28] sm:$0xff]  ;;  %v176_v7 = vld [vmem:[%s3545_s28 + $0x8] sm:$0xff]  ;;  %v178_v8 = vld [vmem:[%s3545_s28 + $0x18] sm:$0xff]  ;;  %s3331_s26 = smul.u32 56, %s164_s25  ;;  %s4679_s9 = scalar_lea.sflag [#allocation4], %s164_s25 }
  0x1b   : > { %v207_v9 = vcombine.high %v175_v6, %v175_v6  ;;  %v255_v10 = vcombine.high %v178_v8, %v178_v8  ;;  %v964_v11 = vrot.slane %v176_v7, %v3540_v5  ;;  %v1637_v12 = vcombine.high %v176_v7, %v176_v7  ;;  %v3552_v13 = vld [vmem:[%s3545_s28 + $0x20] sm:$0xff]  ;;  %s3402_s11 = sshll.u32 %s3469_s10, 4  ;;  %s3403_s11 = int_to_ptr.vmem [resolvable:$false] %s3402_s11 }
  0x1c   : > { %v3555_v14 = vld [vmem:[%s3545_s28 + $0x60] sm:$0xff]  ;;  %v214_v15 = vrot.slane %v175_v6, %v3540_v5  ;;  %v262_v16 = vrot.slane %v178_v8, %v3540_v5  ;;  %v3561_v17 = vrot.slane %v3552_v13, %v3540_v5  ;;  %v190_v8 = vld [vmem:[%s3545_s28 + $0x78] sm:$0xff]  ;;  %s3404_s17 = scalar_lea.vmem %s3403_s11, 1792 }
  0x1d   : > { %v399_v18 = vcombine.high %v3555_v14, %v3555_v14  ;;  %v221_v19 = vrot.slane %v207_v9, %v3540_v5  ;;  %v269_v20 = vrot.slane %v255_v10, %v3540_v5  ;;  %v971_v21 = vrot.slane %v964_v11, %v3540_v5 }
  0x1e   : > { %v1321_v22 = vcombine.high %v964_v11, %v964_v11  ;;  %v1644_v23 = vrot.slane %v1637_v12, %v3540_v5  ;;  %v222_v24 = vcombine.high %v214_v15, %v214_v15  ;;  %v230_v25 = vrot.slane %v214_v15, %v3540_v5  ;;  %v3648_v15 = vld [vmem:[%s3545_s28 + $0x68] sm:$0xff] }
  0x1f   : > { %v270_v26 = vcombine.high %v262_v16, %v262_v16  ;;  %v223_v27 = vcombine.high %v221_v19, %v221_v19  ;;  %v3571_v28 = vrot.slane %v221_v19, %v3540_v5  ;;  %v271_v29 = vcombine.high %v269_v20, %v269_v20 }
  0x20   : > { %v3574_v30 = vrot.slane %v269_v20, %v3540_v5  ;;  %v1328_v31 = vrot.slane %v1321_v22, %v3540_v5  ;;  %v3578_v32 = vrot.slane %v1644_v23, %v3540_v5  ;;  %v244_v33 = vrot.slane %v222_v24, %v3540_v5 }
  0x21   : > { %v3582_v34 = vrot.slane %v262_v16, %v3540_v5  ;;  %v251_v35 = vrot.slane %v223_v27, %v3540_v5  ;;  %v3586_v36 = vrot.slane %v271_v29, %v3540_v5  ;;  %v3593_v38 = vrot.slane %v270_v26, %v3540_v5 }
  0x22   : > { %v3590_v37 = vcombine.high %v3574_v30, %v3574_v30  ;;  %v1393_v39 = vcombine.low %v971_v21, %v1328_v31  ;;  %v3254_v40 = vcombine.high %v971_v21, %v1328_v31  ;;  %v591_v42 = vcombine.low %v230_v25, %v244_v33 }
  0x23   : > { %4746 = vst [vmem:[#allocation6_spill] sm:$0xff] %v3593_v38  ;;  %v3597_v41 = vcombine.high %v3582_v34, %v3582_v34  ;;  %v3250_v44 = vcombine.high %v3571_v28, %v251_v35  ;;  %v3246_v46 = vcombine.high %v230_v25, %v244_v33  ;;  %v593_v49 = vcombine.low %v3571_v28, %v251_v35 }
  0x24   : > { %v642_v43 = vcombine.low %v3586_v36, %v3590_v37  ;;  %v1766_v45 = vcombine.low %v3578_v32, %v3590_v37  ;;  %v1401_v47 = vrot.slane %v1393_v39, %v3540_v5  ;;  %v3606_v48 = vrot.slane %v3254_v40, %v3540_v5 }
  0x25   : > { %4747 = vst [vmem:[#allocation7_spill] sm:$0xff] %v3597_v41  ;;  %v3610_v50 = vrot.slane %v591_v42, %v3540_v5  ;;  %v1085_v51 = vrot.slane %v3250_v44, %v3540_v5  ;;  %v3615_v53 = vrot.slane %v3246_v46, %v3540_v5  ;;  %v3620_v55 = vrot.slane %v593_v49, %v3540_v5  ;;  %v3258_v46 = vld.sshfl [vmem:[%s3545_s28 + $0x10] sm:$0x13 pattern:$0x75316420] }
  0x26   : > { %v1780_v52 = vrot.slane %v1766_v45, %v3540_v5  ;;  %v1078_v56 = vcombine.low %v971_v21, %v3597_v41  ;;  %v3625_v57 = vrot.slane %v3561_v17, %v3540_v5  ;;  %v2009_v58 = vcombine.high %v1644_v23, %v1644_v23 }
  0x27   : > { %v1781_v59 = vcombine.low %v1085_v51, %v1401_v47  ;;  %v2017_v62 = vcombine.high %v3578_v32, %v3578_v32  ;;  %v1093_v0 = vcombine.low %v3615_v53, %v3620_v55  ;;  %v2097_v2 = vcombine.low %v1401_v47, %v3606_v48 }
  0x28   : > { %v1782_v60 = vcombine.low %v3606_v48, %v1780_v52  ;;  %v1092_v63 = vrot.slane %v1078_v56, %v3540_v5  ;;  %v3636_v1 = vrot.slane %v2009_v58, %v3540_v5  ;;  %v1329_v7 = vcombine.high %v971_v21, %v971_v21 }
  0x29   : > { %v1789_v3 = vrot.slane %v1781_v59, %v3540_v5  ;;  %v2082_v6 = vcombine.low %v2017_v62, %v3625_v57  ;;  %v1101_v10 = vrot.slane %v1093_v0, %v3540_v5  ;;  %v2105_v12 = vrot.slane %v2097_v2, %v3540_v5 }
  0x2a   : > { %v1796_v4 = vrot.slane %v1782_v60, %v3540_v5  ;;  %v1094_v9 = vcombine.low %v1085_v51, %v1092_v63  ;;  %v2081_v11 = vcombine.low %v3578_v32, %v3636_v1  ;;  %v1394_v20 = vcombine.low %v1329_v7, %v3574_v30 }
  0x2b   : > { %v2096_v19 = vrot.slane %v2082_v6, %v3540_v5  ;;  %v1409_v22 = vcombine.low %v3620_v55, %v1085_v51  ;;  %v413_v24 = vrot.slane %v399_v18, %v3540_v5  ;;  %v447_v25 = vcombine.high %v190_v8, %v190_v8 }
  0x2c   : > { %v1797_v16 = vcombine.low %v1789_v3, %v1796_v4  ;;  %v1108_v21 = vrot.slane %v1094_v9, %v3540_v5  ;;  %v3655_v23 = vrot.slane %v2081_v11, %v3540_v5  ;;  %v1408_v26 = vrot.slane %v1394_v20, %v3540_v5 }
  0x2d   : > { %v1417_v27 = vrot.slane %v1409_v22, %v3540_v5  ;;  %v454_v29 = vrot.slane %v190_v8, %v3540_v5  ;;  %v3667_v31 = vrot.slane %v3648_v15, %v3540_v5  ;;  %v415_v39 = vcombine.high %v413_v24, %v413_v24 }
  0x2e   : > { %1980 = vrot.lane.b32.xlu1 %v1797_v16, %s3461_s29  ;;  %v1109_v33 = vcombine.low %v1101_v10, %v1108_v21  ;;  %v2098_v35 = vcombine.low %v3655_v23, %v2096_v19  ;;  %v3671_v18 = vrot.slane %v413_v24, %v3540_v5  ;;  %v1410_v40 = vcombine.low %v1401_v47, %v1408_v26  ;;  %v3735_v24 = vld [vmem:[%s3545_s28 + $0x38] sm:$0xff] }
  0x2f   : > { %v461_v42 = vrot.slane %v447_v25, %v3540_v5  ;;  %v462_v44 = vcombine.high %v454_v29, %v454_v29  ;;  %v3675_v45 = vrot.slane %v454_v29, %v3540_v5  ;;  %v3681_v51 = vrot.slane %v415_v39, %v3540_v5 }
  0x30   : > { %1292 = vrot.lane.b32.xlu0 %v1109_v33, %s3462_s30  ;;  %v2112_v49 = vrot.slane %v2098_v35, %v3540_v5  ;;  %v3685_v52 = vrot.slane %v3667_v31, %v3540_v5  ;;  %v3689_v47 = vcombine.high %v3625_v57, %v3625_v57  ;;  %v1424_v56 = vrot.slane %v1410_v40, %v3540_v5 }
  0x31   : > { %v463_v58 = vcombine.high %v461_v42, %v461_v42  ;;  %v3693_v59 = vrot.slane %v461_v42, %v3540_v5  ;;  %v3696_v60 = vrot.slane %v462_v44, %v3540_v5  ;;  %v3700_v63 = vcombine.high %v3675_v45, %v3675_v45 }
  0x32   : > { %v2113_v62 = vcombine.low %v2105_v12, %v2112_v49  ;;  %v3252_v0 = vcombine.high %v3671_v18, %v3681_v51  ;;  %v2347_v2 = vrot.slane %v3258_v46, %v3540_v5  ;;  %v1425_v3 = vcombine.low %v1417_v27, %v1424_v56 }
  0x33   : > { %v3706_v4 = vrot.slane %v463_v58, %v3540_v5  ;;  %v3710_v6 = vcombine.high %v3693_v59, %v3693_v59  ;;  %v494_v7 = vcombine.high %v3696_v60, %v3696_v60  ;;  %v1194_v8 = vcombine.low %v3685_v52, %v3700_v63 }
  0x34   : > { %2296 = vrot.lane.b32.xlu1 %v2113_v62, %s3463_s4  ;;  %v3718_v9 = vrot.slane %v3252_v0, %v3540_v5  ;;  %v3266_v10 = vcombine.high %v3578_v32, %v3636_v1  ;;  %v2454_v11 = vcombine.low %v2347_v2, %v3689_v47  ;;  %1608 = vrot.lane.b32.xlu0 %v1425_v3, %s3464_s5 }
  0x35   : > { %v790_v12 = vcombine.low %v494_v7, %v3693_v59  ;;  %v836_v16 = vcombine.low %v3706_v4, %v3710_v6  ;;  %v2469_v19 = vcombine.low %v3606_v48, %v3655_v23  ;;  %v1653_v20 = vcombine.high %v3552_v13, %v3552_v13 }
  0x36   : > { %v1208_v22 = vrot.slane %v1194_v8, %v3540_v5  ;;  %v2461_v32 = vrot.slane %v3266_v10, %v3540_v5  ;;  %v2468_v1 = vrot.slane %v2454_v11, %v3540_v5  ;;  %v2697_v21 = vcombine.high %v3258_v46, %v3258_v46 }
  0x37   : > { %v3738_v25 = vrot.slane %v790_v12, %v3540_v5  ;;  %v3741_v26 = vrot.slane %v836_v16, %v3540_v5  ;;  %v2477_v48 = vrot.slane %v2469_v19, %v3540_v5  ;;  %v1660_v27 = vrot.slane %v1653_v20, %v3540_v5 }
  0x38   : > { %v1209_v13 = vcombine.low %v3718_v9, %v1208_v22  ;;  %v2470_v29 = vcombine.low %v2461_v32, %v2468_v1  ;;  %v2704_v33 = vrot.slane %v2697_v21, %v3540_v5  ;;  %v2705_v35 = vcombine.high %v2347_v2, %v2347_v2 }
  0x39   : > { %4748 = vst [vmem:[#allocation8_spill] sm:$0xff] %v3741_v26  ;;  %v1210_v39 = vcombine.low %v3738_v25, %v3741_v26  ;;  %v1667_v40 = vrot.slane %v1660_v27, %v3540_v5  ;;  %v2785_v42 = vcombine.low %v3655_v23, %v2461_v32  ;;  %v994_v44 = vrot.slane %v3735_v24, %v3540_v5  ;;  %v191_v23 = vld [vmem:[%s3545_s28 + $0x80] sm:$0xff] }
  0x3a   : > { %v1217_v46 = vrot.slane %v1209_v13, %v3540_v5  ;;  %v2484_v49 = vrot.slane %v2470_v29, %v3540_v5  ;;  %v2769_v56 = vcombine.low %v2347_v2, %v2704_v33  ;;  %v1330_v58 = vcombine.high %v3561_v17, %v3561_v17 }
  0x3b   : > { %v1224_v62 = vrot.slane %v1210_v39, %v3540_v5  ;;  %v2770_v0 = vcombine.low %v2705_v35, %v1667_v40  ;;  %v2793_v3 = vrot.slane %v2785_v42, %v3540_v5  ;;  %v3760_v7 = vrot.slane %v994_v44, %v3540_v5 }
  0x3c   : > { %v2485_v8 = vcombine.low %v2477_v48, %v2484_v49  ;;  %v2777_v10 = vrot.slane %v2769_v56, %v3540_v5  ;;  %v1337_v11 = vrot.slane %v1330_v58, %v3540_v5  ;;  %v1339_v12 = vcombine.high %v994_v44, %v994_v44  ;;  %v181_v49 = vld [vmem:[%s3545_s28 + $0x30] sm:$0xff] }
  0x3d   : > { %v1225_v16 = vcombine.low %v1217_v46, %v1224_v62  ;;  %v2784_v2 = vrot.slane %v2770_v0, %v3540_v5  ;;  %v2018_v19 = vcombine.high %v1660_v27, %v1660_v27  ;;  %v2026_v17 = vcombine.high %v1667_v40, %v1667_v40 }
  0x3e   : > { %2668 = vrot.lane.b32.xlu0 %v2485_v8, %s3465_s6  ;;  %v3768_v20 = vrot.slane %v1339_v12, %v3540_v5  ;;  %v1426_v22 = vcombine.low %v1337_v11, %v3689_v47  ;;  %v1668_v32 = vcombine.high %v1337_v11, %v1337_v11  ;;  %v1039_v1 = vrot.slane %v191_v23, %v3540_v5 }
  0x3f   : > { %1300 = vrot.lane.b32.xlu1 %v1225_v16, %s3462_s30  ;;  %v2786_v21 = vcombine.low %v2777_v10, %v2784_v2  ;;  %v3774_v48 = vrot.slane %v2018_v19, %v3540_v5  ;;  %v1701_v27 = vcombine.high %v3648_v15, %v3648_v15  ;;  %v1717_v13 = vcombine.high %v191_v23, %v191_v23 }
  0x40   : > { %v3779_v29 = vrot.slane %v1426_v22, %v3540_v5  ;;  %v1451_v47 = vcombine.low %v3760_v7, %v3768_v20  ;;  %v1798_v33 = vcombine.low %v1668_v32, %v1667_v40  ;;  %v3784_v35 = vrot.slane %v1039_v1, %v3540_v5  ;;  %v184_v22 = vld [vmem:[%s3545_s28 + $0x48] sm:$0xff] }
  0x41   : > { %v2800_v39 = vrot.slane %v2786_v21, %v3540_v5  ;;  %v2114_v42 = vcombine.low %v3774_v48, %v2026_v17  ;;  %v1366_v44 = vcombine.high %v1039_v1, %v1039_v1  ;;  %v1708_v46 = vrot.slane %v1701_v27, %v3540_v5 }
  0x42   : > { %v3791_v15 = vrot.slane %v1451_v47, %v3540_v5  ;;  %v3794_v56 = vrot.slane %v1798_v33, %v3540_v5  ;;  %v3798_v40 = vcombine.high %v3784_v35, %v3784_v35  ;;  %v3801_v58 = vrot.slane %v1717_v13, %v3540_v5 }
  0x43   : > { %v2801_v62 = vcombine.low %v2793_v3, %v2800_v39  ;;  %v3804_v0 = vrot.slane %v2114_v42, %v3540_v5  ;;  %v1373_v23 = vrot.slane %v1366_v44, %v3540_v5  ;;  %v3808_v8 = vrot.slane %v1708_v46, %v3540_v5 }
  0x44   : > { %v2122_v10 = vcombine.low %v3779_v29, %v3794_v56  ;;  %v3814_v11 = vrot.slane %v3801_v58, %v3540_v5  ;;  %v2045_v12 = vcombine.high %v1708_v46, %v1708_v46  ;;  %v303_v16 = vcombine.high %v181_v49, %v181_v49 }
  0x45   : > { %2984 = vrot.lane.b32.xlu1 %v2801_v62, %s3466_s7  ;;  %v2123_v3 = vcombine.low %v3804_v0, %v3791_v15  ;;  %v1542_v2 = vcombine.low %v1373_v23, %v3798_v40  ;;  %v1732_v19 = vcombine.high %v1373_v23, %v1373_v23  ;;  %v2053_v17 = vcombine.high %v3808_v8, %v3808_v8 }
  0x46   : > { %v2130_v32 = vrot.slane %v2122_v10, %v3540_v5  ;;  %v3825_v1 = vrot.slane %v2045_v12, %v3540_v5  ;;  %v317_v21 = vrot.slane %v303_v16, %v3540_v5  ;;  %v351_v27 = vcombine.high %v184_v22, %v184_v22 }
  0x47   : > { %v2137_v13 = vrot.slane %v2123_v3, %v3540_v5  ;;  %v3830_v47 = vrot.slane %v1542_v2, %v3540_v5  ;;  %v1914_v33 = vcombine.low %v1732_v19, %v3814_v11  ;;  %v2198_v39 = vcombine.low %v2053_v17, %v3784_v35 }
  0x48   : > { %v2197_v42 = vcombine.low %v3808_v8, %v3825_v1  ;;  %v319_v44 = vcombine.high %v317_v21, %v317_v21  ;;  %v3837_v46 = vrot.slane %v317_v21, %v3540_v5  ;;  %v358_v62 = vrot.slane %v184_v22, %v3540_v5 }
  0x49   : > { %v2138_v23 = vcombine.low %v2130_v32, %v2137_v13  ;;  %v3841_v10 = vrot.slane %v1914_v33, %v3540_v5  ;;  %v2212_v12 = vrot.slane %v2198_v39, %v3540_v5  ;;  %v3845_v16 = vrot.slane %v351_v27, %v3540_v5 }
  0x4a   : > { %v3848_v3 = vrot.slane %v2197_v42, %v3540_v5  ;;  %v347_v2 = vrot.slane %v319_v44, %v3540_v5  ;;  %v366_v19 = vcombine.high %v358_v62, %v358_v62  ;;  %v3852_v17 = vrot.slane %v358_v62, %v3540_v5 }
  0x4b   : > { %2298 = vrot.lane.b32.xlu0 %v2138_v23, %s3463_s4  ;;  %v2214_v22 = vcombine.low %v3830_v47, %v3841_v10  ;;  %v3859_v32 = vrot.slane %v3845_v16, %v3540_v5  ;;  %v3865_v21 = vrot.slane %v642_v43, %v3540_v5  ;;  %v972_v27 = vcombine.high %v3586_v36, %v3586_v36 }
  0x4c   : > { %v2213_v13 = vcombine.low %v3848_v3, %v2212_v12  ;;  %v3871_v33 = vrot.slane %v366_v19, %v3540_v5  ;;  %v3875_v39 = vcombine.high %v3852_v17, %v3852_v17  ;;  %v690_v42 = vcombine.low %v3837_v46, %v347_v2 }
  0x4d   : > { %4749 = vst [vmem:[#allocation9_spill] sm:$0xff] %v3865_v21  ;;  %v2228_v44 = vrot.slane %v2214_v22, %v3540_v5  ;;  %v3251_v37 = vcombine.high %v3837_v46, %v347_v2  ;;  %v1110_v43 = vcombine.low %v972_v27, %v3625_v57  ;;  %v302_v36 = vcombine.high %v3593_v38, %v3593_v38 }
  0x4e   : > { %v2221_v62 = vrot.slane %v2213_v13, %v3540_v5  ;;  %v398_v23 = vcombine.high %v3871_v33, %v3871_v33  ;;  %v3887_v12 = vrot.slane %v690_v42, %v3540_v5  ;;  %v1136_v19 = vcombine.low %v3760_v7, %v3875_v39 }
  0x4f   : > { %v3892_v22 = vrot.slane %v3251_v37, %v3540_v5  ;;  %v3895_v2 = vrot.slane %v1110_v43, %v3540_v5  ;;  %v310_v57 = vrot.slane %v181_v49, %v3540_v5  ;;  %v641_v27 = vcombine.low %v302_v36, %v3574_v30 }
  0x50   : > { %v2229_v13 = vcombine.low %v2221_v62, %v2228_v44  ;;  %v738_v54 = vcombine.low %v398_v23, %v3859_v32  ;;  %v1150_v61 = vrot.slane %v1136_v19, %v3540_v5  ;;  %v1435_v42 = vcombine.low %v3779_v29, %v3887_v12 }
  0x51   : > { %v1151_v41 = vcombine.low %v3887_v12, %v3892_v22  ;;  %v1434_v37 = vcombine.low %v3865_v21, %v3895_v2  ;;  %v318_v43 = vcombine.high %v310_v57, %v310_v57  ;;  %v3908_v38 = vrot.slane %v310_v57, %v3540_v5 }
  0x52   : > { %2304 = vrot.lane.b32.xlu1 %v2229_v13, %s3463_s4  ;;  %v3912_v30 = vrot.slane %v738_v54, %v3540_v5  ;;  %v1449_v49 = vrot.slane %v1435_v42, %v3540_v5  ;;  %v3916_v44 = vrot.slane %v641_v27, %v3540_v5  ;;  %v1032_v36 = vcombine.high %v3706_v4, %v3706_v4 }
  0x53   : > { %4750 = vst [vmem:[#allocation10_spill] sm:$0xff] %v3908_v38  ;;  %v1159_v62 = vrot.slane %v1151_v41, %v3540_v5  ;;  %v1442_v23 = vrot.slane %v1434_v37, %v3540_v5  ;;  %v3923_v19 = vrot.slane %v318_v43, %v3540_v5  ;;  %v1357_v54 = vcombine.high %v3667_v31, %v3667_v31  ;;  %v193_v31 = vld [vmem:[%s3545_s28 + $0x90] sm:$0xff] }
  0x54   : > { %4751 = vst [vmem:[#allocation11_spill] sm:$0xff] %v3912_v30  ;;  %4752 = vst [vmem:[#allocation12_spill] sm:$0xff] %v3916_v44  ;;  %v1152_v57 = vcombine.low %v1150_v61, %v3912_v30  ;;  %v1118_v13 = vcombine.low %v3916_v44, %v3865_v21  ;;  %v1226_v27 = vcombine.low %v1032_v36, %v3784_v35 }
  0x55   : > { %4753 = vst [vmem:[#allocation13_spill] sm:$0xff] %v3923_v19  ;;  %v1882_v4 = vcombine.low %v3808_v8, %v3710_v6  ;;  %v1450_v42 = vcombine.low %v1442_v23, %v1449_v49  ;;  %v3247_v41 = vcombine.high %v3908_v38, %v3923_v19  ;;  %v1364_v37 = vrot.slane %v1357_v54, %v3540_v5  ;;  %v4148_v38 = vld [vmem:[%s3545_s28 + $0x50] sm:$0xff] }
  0x56   : > { %v1365_v43 = vcombine.high %v3685_v52, %v3685_v52  ;;  %v1166_v61 = vrot.slane %v1152_v57, %v3540_v5  ;;  %v1126_v30 = vrot.slane %v1118_v13, %v3540_v5  ;;  %v3942_v21 = vrot.slane %v1226_v27, %v3540_v5 }
  0x57   : > { %v1896_v35 = vrot.slane %v1882_v4, %v3540_v5  ;;  %1610 = vrot.lane.b32.xlu1 %v1450_v42, %s3464_s5  ;;  %v3947_v6 = vrot.slane %v3247_v41, %v3540_v5  ;;  %v3256_v49 = vcombine.high %v3685_v52, %v1364_v37  ;;  %v1509_v36 = vcombine.low %v3685_v52, %v1364_v37 }
  0x58   : > { %v1510_v23 = vcombine.low %v1365_v43, %v3693_v59  ;;  %v1167_v54 = vcombine.low %v1159_v62, %v1166_v61  ;;  %v1898_v57 = vcombine.low %v3942_v21, %v3830_v47  ;;  %v1526_v13 = vcombine.low %v3741_v26, %v3942_v21 }
  0x59   : > { %v495_v27 = vcombine.high %v193_v31, %v193_v31  ;;  %v1119_v4 = vcombine.low %v3895_v2, %v3947_v6  ;;  %v3959_v42 = vrot.slane %v3256_v49, %v3540_v5  ;;  %v3962_v41 = vrot.slane %v1509_v36, %v3540_v5 }
  0x5a   : > { %v1524_v52 = vrot.slane %v1510_v23, %v3540_v5  ;;  %1296 = vrot.lane.b32.xlu0 %v1167_v54, %s3462_s30  ;;  %v1912_v59 = vrot.slane %v1898_v57, %v3540_v5  ;;  %v1540_v62 = vrot.slane %v1526_v13, %v3540_v5  ;;  %v502_v37 = vrot.slane %v193_v31, %v3540_v5 }
  0x5b   : > { %v509_v43 = vrot.slane %v495_v27, %v3540_v5  ;;  %v1133_v61 = vrot.slane %v1119_v4, %v3540_v5  ;;  %v1897_v49 = vcombine.low %v3959_v42, %v1896_v35  ;;  %v1806_v23 = vcombine.low %v3895_v2, %v3779_v29 }
  0x5c   : > { %v1525_v36 = vcombine.low %v3962_v41, %v1524_v52  ;;  %v510_v26 = vcombine.high %v502_v37, %v502_v37  ;;  %v3976_v57 = vrot.slane %v502_v37, %v3540_v5  ;;  %v1807_v35 = vcombine.low %v3794_v56, %v3892_v22  ;;  %v3991_v37 = vld.sshfl [vmem:[%s3545_s28 + $0x70] sm:$0x13 pattern:$0x75316420] }
  0x5d   : > { %v511_v54 = vcombine.high %v509_v43, %v509_v43  ;;  %v3979_v13 = vrot.slane %v509_v43, %v3540_v5  ;;  %v1134_v31 = vcombine.low %v1126_v30, %v1133_v61  ;;  %v1905_v27 = vrot.slane %v1897_v49, %v3540_v5 }
  0x5e   : > { %4754 = vst [vmem:[#allocation14_spill] sm:$0xff] %v3976_v57  ;;  %v1533_v4 = vrot.slane %v1525_v36, %v3540_v5  ;;  %v3986_v52 = vrot.slane %v510_v26, %v3540_v5  ;;  %v1814_v2 = vrot.slane %v1806_v23, %v3540_v5  ;;  %v2054_v30 = vcombine.high %v3801_v58, %v3801_v58 }
  0x5f   : > { %4755 = vst [vmem:[#allocation15_spill] sm:$0xff] %v3979_v13  ;;  %v539_v29 = vrot.slane %v511_v54, %v3540_v5  ;;  %1294 = vrot.lane.b32.xlu0 %v1134_v31, %s3462_s30  ;;  %v1913_v43 = vcombine.low %v1905_v27, %v1912_v59  ;;  %v1821_v49 = vrot.slane %v1807_v35, %v3540_v5  ;;  %v4012_v31 = vld.sshfl [vmem:[%s3545_s28 + $0x28] sm:$0x13 pattern:$0x75316420] }
  0x60   : > { %4756 = vst [vmem:[#allocation16_spill] sm:$0xff] %v3986_v52  ;;  %v1541_v61 = vcombine.low %v1533_v4, %v1540_v62  ;;  %v2062_v26 = vcombine.high %v3814_v11, %v3814_v11  ;;  %v3249_v36 = vcombine.high %v3976_v57, %v3986_v52  ;;  %v2061_v44 = vrot.slane %v2054_v30, %v3540_v5  ;;  %v4026_v30 = vld [vmem:[%s3545_s28 + $0x98] sm:$0xff]  ;;  %v4072_v57 = vld.sshfl [vmem:[%s3545_s28 + $0x88] sm:$0x13 pattern:$0x75316420] }
  0x61   : > { %v839_v23 = vcombine.low %v3979_v13, %v539_v29  ;;  %v3253_v54 = vcombine.high %v3979_v13, %v539_v29  ;;  %1988 = vrot.lane.b32.xlu1 %v1913_v43, %s3461_s29  ;;  %v1822_v58 = vcombine.low %v1814_v2, %v1821_v49  ;;  %v4007_v59 = vrot.slane %v3991_v37, %v3540_v5 }
  0x62   : > { %v3268_v62 = vcombine.high %v3808_v8, %v3825_v1  ;;  %v3255_v27 = vcombine.high %v3760_v7, %v3768_v20  ;;  %v4017_v4 = vrot.slane %v3249_v36, %v3540_v5  ;;  %v2230_v2 = vcombine.low %v2061_v44, %v2062_v26 }
  0x63   : > { %v4020_v35 = vrot.slane %v839_v23, %v3540_v5  ;;  %v4023_v29 = vrot.slane %v3253_v54, %v3540_v5  ;;  %1616 = vrot.lane.b32.xlu0 %v1541_v61, %s3464_s5  ;;  %v2570_v8 = vcombine.low %v4007_v59, %v3798_v40  ;;  %v2348_v43 = vcombine.high %v3774_v48, %v3774_v48 }
  0x64   : > { %4757 = vst [vmem:[#allocation17_spill] sm:$0xff] %v4017_v4  ;;  %v4032_v1 = vrot.slane %v3268_v62, %v3540_v5  ;;  %v4035_v20 = vrot.slane %v3255_v27, %v3540_v5  ;;  %v1242_v49 = vcombine.low %v3942_v21, %v4017_v4  ;;  %v4044_v61 = vrot.slane %v2230_v2, %v3540_v5 }
  0x65   : > { %4758 = vst [vmem:[#allocation18_spill] sm:$0xff] %v4020_v35  ;;  %v1243_v26 = vcombine.low %v4020_v35, %v4023_v29  ;;  %v4048_v40 = vrot.slane %v4012_v31, %v3540_v5  ;;  %v2584_v36 = vrot.slane %v2570_v8, %v3540_v5  ;;  %v2494_v23 = vcombine.low %v3794_v56, %v3804_v0 }
  0x66   : > { %v1054_v48 = vrot.slane %v4026_v30, %v3540_v5  ;;  %v1558_v21 = vcombine.low %v3830_v47, %v4020_v35  ;;  %v1250_v54 = vrot.slane %v1242_v49, %v3540_v5  ;;  %v2586_v27 = vcombine.low %v3841_v10, %v4044_v61 }
  0x67   : > { %v1257_v62 = vrot.slane %v1243_v26, %v3540_v5  ;;  %v2486_v2 = vcombine.low %v2348_v43, %v4048_v40  ;;  %1982 = vrot.lane.b32.xlu0 %v1822_v58, %s3461_s29  ;;  %v2585_v56 = vcombine.low %v4032_v1, %v2584_v36  ;;  %v2502_v8 = vrot.slane %v2494_v23, %v3540_v5 }
  0x68   : > { %v4066_v13 = vrot.slane %v1054_v48, %v3540_v5  ;;  %v1375_v4 = vcombine.high %v1054_v48, %v1054_v48  ;;  %v2600_v49 = vrot.slane %v2586_v27, %v3540_v5  ;;  %v1566_v35 = vrot.slane %v1558_v21, %v3540_v5 }
  0x69   : > { %v1258_v47 = vcombine.low %v1250_v54, %v1257_v62  ;;  %v2493_v26 = vrot.slane %v2486_v2, %v3540_v5  ;;  %v2593_v43 = vrot.slane %v2585_v56, %v3540_v5  ;;  %v367_v36 = vcombine.high %v3845_v16, %v3845_v16 }
  0x6a   : > { %v1382_v58 = vrot.slane %v1375_v4, %v3540_v5  ;;  %v4080_v23 = vcombine.high %v3859_v32, %v3859_v32  ;;  %v1347_v21 = vcombine.high %v3760_v7, %v3760_v7  ;;  %v1467_v54 = vcombine.low %v3892_v22, %v3791_v15 }
  0x6b   : > { %1302 = vrot.lane.b32.xlu1 %v1258_v47, %s3462_s30  ;;  %v2495_v48 = vcombine.low %v2493_v26, %v4035_v20  ;;  %v2408_v62 = vcombine.high %v2061_v44, %v2061_v44  ;;  %v2601_v27 = vcombine.low %v2593_v43, %v2600_v49  ;;  %v4090_v16 = vrot.slane %v367_v36, %v3540_v5 }
  0x6c   : > { %v1543_v4 = vcombine.low %v4066_v13, %v1382_v58  ;;  %v4094_v2 = vrot.slane %v4072_v57, %v3540_v5  ;;  %v1452_v47 = vcombine.low %v1347_v21, %v3859_v32  ;;  %v1475_v7 = vrot.slane %v1467_v54, %v3540_v5 }
  0x6d   : > { %v2509_v56 = vrot.slane %v2495_v48, %v3540_v5  ;;  %v2733_v22 = vcombine.high %v3991_v37, %v3991_v37  ;;  %v739_v49 = vcombine.low %v4090_v16, %v4080_v23  ;;  %v2741_v36 = vcombine.high %v4007_v59, %v4007_v59 }
  0x6e   : > { %v4102_v44 = vrot.slane %v1543_v4, %v3540_v5  ;;  %v2602_v43 = vcombine.low %v2408_v62, %v4094_v2  ;;  %v1466_v32 = vrot.slane %v1452_v47, %v3540_v5  ;;  %v1669_v37 = vcombine.high %v3735_v24, %v3735_v24 }
  0x6f   : > { %2676 = vrot.lane.b32.xlu1 %v2601_v27, %s3465_s6  ;;  %v2510_v48 = vcombine.low %v2502_v8, %v2509_v56  ;;  %v2740_v21 = vrot.slane %v2733_v22, %v3540_v5  ;;  %v4117_v4 = vrot.slane %v739_v49, %v3540_v5  ;;  %v2886_v52 = vcombine.low %v2741_v36, %v3814_v11 }
  0x70   : > { %v1559_v54 = vcombine.low %v4023_v29, %v4102_v44  ;;  %v4120_v62 = vrot.slane %v2602_v43, %v3540_v5  ;;  %v1676_v27 = vrot.slane %v1669_v37, %v3540_v5  ;;  %v2706_v24 = vcombine.high %v4012_v31, %v4012_v31 }
  0x71   : > { %4759 = vst [vmem:[#allocation19_spill] sm:$0xff] %v4117_v4  ;;  %2670 = vrot.lane.b32.xlu0 %v2510_v48, %s3465_s6  ;;  %v2885_v8 = vcombine.low %v4007_v59, %v2740_v21  ;;  %v2714_v56 = vcombine.high %v4048_v40, %v4048_v40  ;;  %v1468_v22 = vcombine.low %v1466_v32, %v4117_v4 }
  0x72   : > { %v1573_v47 = vrot.slane %v1559_v54, %v3540_v5  ;;  %v2900_v49 = vrot.slane %v2886_v52, %v3540_v5  ;;  %v2902_v11 = vcombine.low %v4044_v61, %v4120_v62  ;;  %v4137_v43 = vrot.slane %v1676_v27, %v3540_v5 }
  0x73   : > { %v2893_v59 = vrot.slane %v2885_v8, %v3540_v5  ;;  %v2027_v36 = vcombine.high %v1676_v27, %v1676_v27  ;;  %v2713_v31 = vrot.slane %v2706_v24, %v3540_v5  ;;  %v1482_v40 = vrot.slane %v1468_v22, %v3540_v5 }
  0x74   : > { %v1574_v48 = vcombine.low %v1566_v35, %v1573_v47  ;;  %v2916_v21 = vrot.slane %v2902_v11, %v3540_v5  ;;  %v2810_v32 = vcombine.low %v3804_v0, %v2493_v26  ;;  %v3257_v8 = vcombine.high %v4066_v13, %v1382_v58 }
  0x75   : > { %v2901_v37 = vcombine.low %v2893_v59, %v2900_v49  ;;  %v4144_v52 = vrot.slane %v2027_v36, %v3540_v5  ;;  %v2802_v54 = vcombine.low %v2713_v31, %v2714_v56  ;;  %v1483_v27 = vcombine.low %v1475_v7, %v1482_v40 }
  0x76   : > { %1618 = vrot.lane.b32.xlu1 %v1574_v48, %s3464_s5  ;;  %v2818_v35 = vrot.slane %v2810_v32, %v3540_v5  ;;  %v1930_v24 = vcombine.low %v3841_v10, %v4023_v29  ;;  %v1002_v0 = vcombine.high %v4090_v16, %v4090_v16  ;;  %v4161_v47 = vrot.slane %v3257_v8, %v3540_v5 }
  0x77   : > { %v2909_v26 = vrot.slane %v2901_v37, %v3540_v5  ;;  %v2139_v56 = vcombine.low %v4137_v43, %v4144_v52  ;;  %v2809_v58 = vrot.slane %v2802_v54, %v3540_v5  ;;  %1612 = vrot.lane.b32.xlu0 %v1483_v27, %s3464_s5  ;;  %v1009_v10 = vrot.slane %v4148_v38, %v3540_v5 }
  0x78   : > { %v1938_v7 = vrot.slane %v1930_v24, %v3540_v5  ;;  %v1824_v29 = vcombine.low %v4137_v43, %v4080_v23  ;;  %v1839_v16 = vcombine.low %v3791_v15, %v4035_v20  ;;  %v1931_v11 = vcombine.low %v4102_v44, %v4161_v47 }
  0x79   : > { %v2917_v22 = vcombine.low %v2909_v26, %v2916_v21  ;;  %v4172_v49 = vrot.slane %v2139_v56, %v3540_v5  ;;  %v1733_v59 = vcombine.high %v4026_v30, %v4026_v30  ;;  %v1016_v36 = vrot.slane %v1009_v10, %v3540_v5 }
  0x7a   : > { %v1838_v31 = vrot.slane %v1824_v29, %v3540_v5  ;;  %v1847_v23 = vrot.slane %v1839_v16, %v3540_v5  ;;  %v2246_v15 = vcombine.low %v4044_v61, %v4102_v44  ;;  %v1945_v40 = vrot.slane %v1931_v11, %v3540_v5  ;;  %v196_v61 = vld [vmem:[%s3545_s28 + $0xa8] sm:$0xff] }
  0x7b   : > { %2992 = vrot.lane.b32.xlu1 %v2917_v22, %s3466_s7  ;;  %v2811_v48 = vcombine.low %v2809_v58, %v4172_v49  ;;  %v1740_v21 = vrot.slane %v1733_v59, %v3540_v5  ;;  %v1348_v32 = vcombine.high %v1009_v10, %v1009_v10  ;;  %v1168_v37 = vcombine.low %v1002_v0, %v1016_v36 }
  0x7c   : > { %v4188_v30 = vrot.slane %v2246_v15, %v3540_v5  ;;  %v4190_v54 = vcombine.high %v1016_v36, %v1016_v36  ;;  %v2035_v8 = vcombine.high %v4137_v43, %v4137_v43  ;;  %v1946_v27 = vcombine.low %v1938_v7, %v1945_v40  ;;  %v4210_v7 = vld [vmem:[%s3545_s28 + $0xb0] sm:$0xff] }
  0x7d   : > { %v2825_v44 = vrot.slane %v2811_v48, %v3540_v5  ;;  %v4197_v24 = vrot.slane %v1740_v21, %v3540_v5  ;;  %v2063_v26 = vcombine.high %v1740_v21, %v1740_v21  ;;  %v4200_v56 = vrot.slane %v1168_v37, %v3540_v5 }
  0x7e   : > { %v4203_v0 = vrot.slane %v1348_v32, %v3540_v5  ;;  %v2140_v58 = vcombine.low %v2035_v8, %v1016_v36  ;;  %v2155_v10 = vcombine.low %v4035_v20, %v4172_v49  ;;  %v543_v22 = vcombine.high %v196_v61, %v196_v61 }
  0x7f   : > { %v2826_v29 = vcombine.low %v2818_v35, %v2825_v44  ;;  %1990 = vrot.lane.b32.xlu1 %v1946_v27, %s3461_s29  ;;  %v2070_v16 = vrot.slane %v2063_v26, %v3540_v5  ;;  %v550_v11 = vrot.slane %v196_v61, %v3540_v5  ;;  %v1840_v59 = vcombine.low %v1838_v31, %v4200_v56 }
  0x80   : > { %v1484_v15 = vcombine.low %v4203_v0, %v4190_v54  ;;  %v2154_v36 = vrot.slane %v2140_v58, %v3540_v5  ;;  %v2163_v48 = vrot.slane %v2155_v10, %v3540_v5  ;;  %v557_v35 = vrot.slane %v543_v22, %v3540_v5 }
  0x81   : > { %2986 = vrot.lane.b32.xlu0 %v2826_v29, %s3466_s7  ;;  %v2231_v20 = vcombine.low %v4197_v24, %v2070_v16  ;;  %v558_v40 = vcombine.high %v550_v11, %v550_v11  ;;  %v4222_v21 = vrot.slane %v550_v11, %v3540_v5  ;;  %v1854_v32 = vrot.slane %v1840_v59, %v3540_v5 }
  0x82   : > { %v4226_v31 = vrot.slane %v1484_v15, %v3540_v5  ;;  %v4230_v37 = vrot.slane %v4210_v7, %v3540_v5  ;;  %v406_v8 = vrot.slane %v3555_v14, %v3540_v5  ;;  %v559_v44 = vcombine.high %v557_v35, %v557_v35 }
  0x83   : > { %4760 = vst [vmem:[#allocation20_spill] sm:$0xff] %v4222_v21  ;;  %v4235_v61 = vrot.slane %v2231_v20, %v3540_v5  ;;  %v4238_v27 = vrot.slane %v557_v35, %v3540_v5  ;;  %v4241_v26 = vrot.slane %v558_v40, %v3540_v5  ;;  %v1855_v58 = vcombine.low %v1847_v23, %v1854_v32 }
  0x84   : > { %v2156_v10 = vcombine.low %v2154_v36, %v4226_v31  ;;  %v4246_v29 = vcombine.high %v4222_v21, %v4222_v21  ;;  %v4250_v14 = vrot.slane %v4230_v37, %v3540_v5  ;;  %v587_v11 = vrot.slane %v559_v44, %v3540_v5 }
  0x85   : > { %4761 = vst [vmem:[#allocation21_spill] sm:$0xff] %v4241_v26  ;;  %v2247_v22 = vcombine.low %v4161_v47, %v4235_v61  ;;  %v4257_v59 = vcombine.high %v4238_v27, %v4238_v27  ;;  %v590_v23 = vcombine.high %v4241_v26, %v4241_v26  ;;  %1984 = vrot.lane.b32.xlu0 %v1855_v58, %s3461_s29 }
  0x86   : > { %4762 = vst [vmem:[#allocation22_spill] sm:$0xff] %v4246_v29  ;;  %v2170_v15 = vrot.slane %v2156_v10, %v3540_v5  ;;  %v1259_v36 = vcombine.low %v4066_v13, %v4246_v29  ;;  %v414_v20 = vcombine.high %v406_v8, %v406_v8  ;;  %v4266_v35 = vrot.slane %v406_v8, %v3540_v5 }
  0x87   : > { %v2261_v40 = vrot.slane %v2247_v22, %v3540_v5  ;;  %v887_v32 = vcombine.low %v590_v23, %v4238_v27  ;;  %v888_v44 = vcombine.low %v587_v11, %v4257_v59  ;;  %v1062_v21 = vcombine.high %v587_v11, %v587_v11 }
  0x88   : > { %4763 = vst [vmem:[#allocation23_spill] sm:$0xff] %v4266_v35  ;;  %v2171_v19 = vcombine.low %v2163_v48, %v2170_v15  ;;  %v1267_v26 = vrot.slane %v1259_v36, %v3540_v5  ;;  %v4273_v58 = vrot.slane %v414_v20, %v3540_v5  ;;  %v787_v10 = vcombine.low %v3671_v18, %v3681_v51  ;;  %v4302_v36 = vld.sshfl [vmem:[%s3545_s28 + $0x40] sm:$0x13 pattern:$0x75316420] }
  0x89   : > { %v2262_v8 = vcombine.low %v4188_v30, %v2261_v40  ;;  %v4279_v29 = vrot.slane %v887_v32, %v3540_v5  ;;  %v4282_v22 = vrot.slane %v888_v44, %v3540_v5  ;;  %v1260_v11 = vcombine.low %v1062_v21, %v4250_v14 }
  0x8a   : > { %4764 = vst [vmem:[#allocation24_spill] sm:$0xff] %v4273_v58  ;;  %2300 = vrot.lane.b32.xlu0 %v2171_v19, %s3463_s4  ;;  %v3248_v48 = vcombine.high %v4266_v35, %v4273_v58  ;;  %v4289_v23 = vrot.slane %v787_v10, %v3540_v5  ;;  %v1176_v51 = vcombine.low %v4117_v4, %v4200_v56 }
  0x8b   : > { %v3269_v30 = vcombine.high %v4197_v24, %v2070_v16  ;;  %2306 = vrot.lane.b32.xlu1 %v2262_v8, %s3463_s4  ;;  %v4296_v15 = vrot.slane %v1260_v11, %v3540_v5  ;;  %v1275_v21 = vcombine.low %v1267_v26, %v4279_v29  ;;  %v2618_v19 = vcombine.low %v4120_v62, %v4161_v47 }
  0x8c   : > { %v1685_v20 = vcombine.high %v4148_v38, %v4148_v38  ;;  %v4307_v40 = vrot.slane %v3248_v48, %v3540_v5  ;;  %v1184_v16 = vrot.slane %v1176_v51, %v3540_v5  ;;  %v1700_v44 = vcombine.high %v4203_v0, %v4203_v0 }
  0x8d   : > { %v4311_v32 = vrot.slane %v3269_v30, %v3540_v5  ;;  %v1276_v26 = vcombine.low %v4282_v22, %v4296_v15  ;;  %v1283_v62 = vrot.slane %v1275_v21, %v3540_v5  ;;  %v2626_v47 = vrot.slane %v2618_v19, %v3540_v5 }
  0x8e   : > { %4765 = vst [vmem:[#allocation25_spill] sm:$0xff] %v4307_v40  ;;  %v1692_v38 = vrot.slane %v1685_v20, %v3540_v5  ;;  %v1177_v10 = vcombine.low %v4307_v40, %v4289_v23  ;;  %v4326_v11 = vrot.slane %v4302_v36, %v3540_v5  ;;  %v3267_v0 = vcombine.high %v4137_v43, %v4144_v52 }
  0x8f   : > { %v2619_v8 = vcombine.low %v4235_v61, %v4311_v32  ;;  %v1290_v48 = vrot.slane %v1276_v26, %v3540_v5  ;;  %v1383_v30 = vcombine.high %v4066_v13, %v4066_v13  ;;  %v1384_v21 = vcombine.high %v4230_v37, %v4230_v37 }
  0x90   : > { %v1699_v51 = vrot.slane %v1692_v38, %v3540_v5  ;;  %v1191_v19 = vrot.slane %v1177_v10, %v3540_v5  ;;  %v2512_v40 = vcombine.low %v4326_v11, %v4190_v54  ;;  %v4341_v43 = vrot.slane %v3267_v0, %v3540_v5 }
  0x91   : > { %v2633_v20 = vrot.slane %v2619_v8, %v3540_v5  ;;  %v1291_v52 = vcombine.low %v1283_v62, %v1290_v48  ;;  %v4344_v4 = vrot.slane %v1384_v21, %v3540_v5  ;;  %v4348_v13 = vcombine.high %v4250_v14, %v4250_v14 }
  0x92   : > { %v1856_v26 = vcombine.low %v1700_v44, %v1699_v51  ;;  %v1192_v37 = vcombine.low %v1184_v16, %v1191_v19  ;;  %v2526_v8 = vrot.slane %v2512_v40, %v3540_v5  ;;  %v2527_v35 = vcombine.low %v4172_v49, %v4341_v43  ;;  %v3264_v16 = vld.sshfl [vmem:[%s3545_s28 + $0xa0] sm:$0x13 pattern:$0x75316420] }
  0x93   : > { %v2634_v10 = vcombine.low %v2626_v47, %v2633_v20  ;;  %1304 = vrot.lane.b32.xlu1 %v1291_v52, %s3462_s30  ;;  %v1575_v44 = vcombine.low %v1383_v30, %v4238_v27  ;;  %v1576_v62 = vcombine.low %v4344_v4, %v4348_v13  ;;  %v1492_v0 = vcombine.low %v4200_v56, %v4226_v31 }
  0x94   : > { %v4355_v54 = vrot.slane %v1856_v26, %v3540_v5  ;;  %1298 = vrot.lane.b32.xlu0 %v1192_v37, %s3462_s30  ;;  %v2535_v40 = vrot.slane %v2527_v35, %v3540_v5  ;;  %v1493_v49 = vcombine.low %v4289_v23, %v3718_v9  ;;  %v4368_v47 = vrot.slane %v3264_v16, %v3540_v5 }
  0x95   : > { %v2742_v27 = vcombine.high %v4072_v57, %v4072_v57  ;;  %v1583_v30 = vrot.slane %v1575_v44, %v3540_v5  ;;  %v4375_v56 = vrot.slane %v1576_v62, %v3540_v5  ;;  %v1500_v21 = vrot.slane %v1492_v0, %v3540_v5 }
  0x96   : > { %v2528_v48 = vcombine.low %v2526_v8, %v4355_v54  ;;  %v1507_v35 = vrot.slane %v1493_v49, %v3540_v5  ;;  %v2750_v20 = vcombine.high %v4094_v2, %v4094_v2  ;;  %v2751_v52 = vcombine.high %v3264_v16, %v3264_v16 }
  0x97   : > { %v2749_v19 = vrot.slane %v2742_v27, %v3540_v5  ;;  %2678 = vrot.lane.b32.xlu1 %v2634_v10, %s3465_s6  ;;  %v1591_v26 = vcombine.low %v1583_v30, %v4282_v22  ;;  %v1592_v37 = vcombine.low %v4296_v15, %v4375_v56  ;;  %v2036_v8 = vcombine.high %v1692_v38, %v1692_v38 }
  0x98   : > { %v2542_v57 = vrot.slane %v2528_v48, %v3540_v5  ;;  %v1508_v44 = vcombine.low %v1500_v21, %v1507_v35  ;;  %v2758_v62 = vrot.slane %v2751_v52, %v3540_v5  ;;  %v2044_v49 = vcombine.high %v1699_v51, %v1699_v51 }
  0x99   : > { %v2918_v0 = vcombine.low %v2749_v19, %v2750_v20  ;;  %v1599_v58 = vrot.slane %v1591_v26, %v3540_v5  ;;  %v1606_v2 = vrot.slane %v1592_v37, %v3540_v5  ;;  %v4391_v10 = vrot.slane %v2036_v8, %v3540_v5 }
  0x9a   : > { %v2543_v27 = vcombine.low %v2535_v40, %v2542_v57  ;;  %v2919_v16 = vcombine.low %v4368_v47, %v2758_v62  ;;  %v2715_v38 = vcombine.high %v4302_v36, %v4302_v36  ;;  %v2723_v30 = vcombine.high %v4326_v11, %v4326_v11 }
  0x9b   : > { %v2926_v48 = vrot.slane %v2918_v0, %v3540_v5  ;;  %v1607_v40 = vcombine.low %v1599_v58, %v1606_v2  ;;  %v2172_v21 = vcombine.low %v4391_v10, %v2044_v49  ;;  %v1749_v35 = vcombine.high %v4210_v7, %v4210_v7 }
  0x9c   : > { %2672 = vrot.lane.b32.xlu0 %v2543_v27, %s3465_s6  ;;  %v1764_v19 = vcombine.high %v4344_v4, %v4344_v4  ;;  %v2933_v20 = vrot.slane %v2919_v16, %v3540_v5  ;;  %v2722_v36 = vrot.slane %v2715_v38, %v3540_v5  ;;  %v2828_v57 = vcombine.low %v2723_v30, %v1699_v51 }
  0x9d   : > { %v2934_v52 = vcombine.low %v2926_v48, %v4235_v61  ;;  %1620 = vrot.lane.b32.xlu1 %v1607_v40, %s3464_s5  ;;  %v4410_v26 = vrot.slane %v2172_v21, %v3540_v5  ;;  %v1756_v58 = vrot.slane %v1749_v35, %v3540_v5  ;;  %v1947_v7 = vcombine.low %v4197_v24, %v4257_v59  ;;  %v3265_v21 = vld.sshfl [vmem:[%s3545_s28 + $0xb8] sm:$0x13 pattern:$0x75316420] }
  0x9e   : > { %v1864_v4 = vcombine.low %v4226_v31, %v4355_v54  ;;  %v2935_v37 = vcombine.low %v4311_v32, %v2933_v20  ;;  %v2827_v8 = vcombine.low %v4326_v11, %v2722_v36  ;;  %v2842_v51 = vrot.slane %v2828_v57, %v3540_v5 }
  0x9f   : > { %v2942_v61 = vrot.slane %v2934_v52, %v3540_v5  ;;  %v1763_v62 = vrot.slane %v1756_v58, %v3540_v5  ;;  %v1955_v0 = vrot.slane %v1947_v7, %v3540_v5  ;;  %v1865_v59 = vcombine.low %v3718_v9, %v3962_v41 }
  0xa0   : > { %1614 = vrot.lane.b32.xlu0 %v1508_v44, %s3464_s5  ;;  %v1872_v31 = vrot.slane %v1864_v4, %v3540_v5  ;;  %v2949_v32 = vrot.slane %v2935_v37, %v3540_v5  ;;  %v2835_v49 = vrot.slane %v2827_v8, %v3540_v5  ;;  %v2844_v11 = vcombine.low %v2842_v51, %v4410_v26  ;;  %v3261_v37 = vld.sshfl [vmem:[%s3545_s28 + $0x58] sm:$0x13 pattern:$0x75316420] }
  0xa1   : > { %v2071_v27 = vcombine.high %v4197_v24, %v4197_v24  ;;  %v1948_v44 = vcombine.low %v1764_v19, %v1763_v62  ;;  %v1963_v2 = vcombine.low %v1955_v0, %v4296_v15  ;;  %v1879_v16 = vrot.slane %v1865_v59, %v3540_v5 }
  0xa2   : > { %v2072_v48 = vcombine.high %v1756_v58, %v1756_v58  ;;  %v2950_v38 = vcombine.low %v2942_v61, %v2949_v32  ;;  %v2843_v9 = vcombine.low %v4341_v43, %v2835_v49  ;;  %v2858_v30 = vrot.slane %v2844_v11, %v3540_v5 }
  0xa3   : > { %v2080_v40 = vcombine.high %v1763_v62, %v1763_v62  ;;  %v1962_v35 = vrot.slane %v1948_v44, %v3540_v5  ;;  %v1971_v20 = vrot.slane %v1963_v2, %v3540_v5  ;;  %v1880_v52 = vcombine.low %v1872_v31, %v1879_v16 }
  0xa4   : > { %v2079_v24 = vrot.slane %v2072_v48, %v3540_v5  ;;  %2994 = vrot.lane.b32.xlu1 %v2950_v38, %s3466_s7  ;;  %v2851_v15 = vrot.slane %v2843_v9, %v3540_v5  ;;  %v2263_v19 = vcombine.low %v2071_v27, %v4250_v14  ;;  %v2180_v43 = vcombine.low %v4355_v54, %v4410_v26 }
  0xa5   : > { %v2181_v36 = vcombine.low %v3962_v41, %v3959_v42  ;;  %v1964_v57 = vcombine.low %v4375_v56, %v1962_v35  ;;  %v2452_v4 = vrot.slane %v3265_v21, %v3540_v5  ;;  %v2635_v41 = vcombine.low %v4368_v47, %v4348_v13 }
  0xa6   : > { %v2264_v58 = vcombine.low %v2079_v24, %v2080_v40  ;;  %v2438_v7 = vcombine.high %v2079_v24, %v2079_v24  ;;  %v2859_v61 = vcombine.low %v2851_v15, %v2858_v30  ;;  %v2271_v8 = vrot.slane %v2263_v19, %v3540_v5 }
  0xa7   : > { %v2188_v51 = vrot.slane %v2180_v43, %v3540_v5  ;;  %v2195_v14 = vrot.slane %v2181_v36, %v3540_v5  ;;  %v1978_v0 = vrot.slane %v1964_v57, %v3540_v5  ;;  %v2378_v49 = vcombine.high %v4391_v10, %v4391_v10  ;;  %v4474_v43 = vpop.permute.xlu1 %1980 }
  0xa8   : > { %v2278_v54 = vrot.slane %v2264_v58, %v3540_v5  ;;  %v2636_v59 = vcombine.low %v2438_v7, %v2452_v4  ;;  %2988 = vrot.lane.b32.xlu0 %v2859_v61, %s3466_s7  ;;  %v2279_v31 = vcombine.low %v2271_v8, %v4375_v56  ;;  %v2392_v11 = vrot.slane %v3261_v37, %v3540_v5 }
  0xa9   : > { %v2196_v32 = vcombine.low %v2188_v51, %v2195_v14  ;;  %v1979_v27 = vcombine.low %v1971_v20, %v1978_v0  ;;  %v2643_v2 = vrot.slane %v2635_v41, %v3540_v5  ;;  %v2553_v38 = vcombine.low %v3959_v42, %v3848_v3  ;;  %v1293_v0 = vpop.permute.xlu0 %1292 }
  0xaa   : > { %v2280_v44 = vcombine.low %v1962_v35, %v2278_v54  ;;  %v2650_v16 = vrot.slane %v2636_v59, %v3540_v5  ;;  %v2287_v48 = vrot.slane %v2279_v31, %v3540_v5  ;;  %v2544_v13 = vcombine.low %v2378_v49, %v2392_v11 }
  0xab   : > { %v2759_v56 = vcombine.high %v4368_v47, %v4368_v47  ;;  %1992 = vrot.lane.b32.xlu1 %v1979_v27, %s3461_s29  ;;  %v2651_v9 = vcombine.low %v2643_v2, %v1962_v35  ;;  %v2760_v40 = vcombine.high %v3265_v21, %v3265_v21  ;;  %v2567_v24 = vrot.slane %v2553_v38, %v3540_v5 }
  0xac   : > { %v2294_v10 = vrot.slane %v2280_v44, %v3540_v5  ;;  %v2652_v30 = vcombine.low %v2278_v54, %v2650_v16  ;;  %1986 = vrot.lane.b32.xlu0 %v1880_v52, %s3461_s29  ;;  %v2551_v20 = vrot.slane %v2544_v13, %v3540_v5  ;;  %v2768_v15 = vcombine.high %v2452_v4, %v2452_v4  ;;  %v3023_v44 = vld [vmem:[%s4721_s1 + $0x18] sm:$0xf]  ;;  %s166_s29 = scalar_lea.vmem [#allocation3], %s3331_s26 }
  0xad   : > { %v2951_v19 = vcombine.low %v2759_v56, %v1763_v62  ;;  %v2659_v47 = vrot.slane %v2651_v9, %v3540_v5  ;;  %v2767_v57 = vrot.slane %v2760_v40, %v3540_v5  ;;  %v2724_v52 = vcombine.high %v3261_v37, %v3261_v37  ;;  %v1609_v38 = vpop.permute.xlu0 %1608  ;;  %s3178_s30 = sshll.u32 %s166_s29, 4  ;;  %s4670_s30 = int_to_ptr.vmem [resolvable:$true] %s3178_s30 }
  0xae   : > { %v2295_v42 = vcombine.low %v2287_v48, %v2294_v10  ;;  %v2666_v36 = vrot.slane %v2652_v30, %v3540_v5  ;;  %v2552_v35 = vcombine.low %v4410_v26, %v2551_v20  ;;  %v2732_v58 = vcombine.high %v2392_v11, %v2392_v11  ;;  %p3405_p0 = scmp.lt.s32.totalorder %s4670_s30, %s3403_s11 }
  0xaf   : > { %v2959_v21 = vrot.slane %v2951_v19, %v3540_v5  ;;  %v2952_v4 = vcombine.low %v2767_v57, %v2768_v15  ;;  %v2869_v62 = vcombine.low %v3848_v3, %v4032_v1  ;;  %v253_v61 = vcombine.high %v3571_v28, %v3571_v28  ;;  %v4495_v28 = vpop.permute.xlu1 %2296  ;;  %v4770_v57 = vld [vmem:[#allocation7_spill] sm:$0xff] }
  0xb0   : > { %2308 = vrot.lane.b32.xlu1 %v2295_v42, %s3463_s4  ;;  %v2667_v7 = vcombine.low %v2659_v47, %v2666_v36  ;;  %2302 = vrot.lane.b32.xlu0 %v2196_v32, %s3463_s4  ;;  %v2560_v8 = vrot.slane %v2552_v35, %v3540_v5  ;;  %v2731_v26 = vrot.slane %v2724_v52, %v3540_v5  ;;  %v4769_v36 = vld [vmem:[#allocation6_spill] sm:$0xff]  ;;  %v4772_v52 = vld [vmem:[#allocation16_spill] sm:$0xff]  ;;  %s3282_s4 = smul.u32 896, %s3512_s16  ;;  %s3398_s16 = scalar_lea.vmem %s4670_s30, 896 }
  0xb1   : > { %v2967_v51 = vcombine.low %v2959_v21, %v2278_v54  ;;  %v2966_v37 = vrot.slane %v2952_v4, %v3540_v5  ;;  %v594_v14 = vcombine.low %v253_v61, %v3582_v34  ;;  %v4766_v3 = vcombine.low %v3610_v50, %v3615_v53  ;;  %v2669_v4 = vpop.permute.xlu0 %2668  ;;  %p3399_p11 = scmp.ne.s32.totalorder %s4670_s30, %s3398_s16  ;;  %p3406_p1 = scmp.lt.s32.totalorder %s3404_s17, %s3398_s16 }
  0xb2   : > { %v2568_v41 = vcombine.low %v2560_v8, %v2567_v24  ;;  %v2860_v59 = vcombine.low %v2731_v26, %v2732_v58  ;;  %v2883_v32 = vrot.slane %v2869_v62, %v3540_v5  ;;  %v445_v50 = vcombine.high %v3671_v18, %v3671_v18  ;;  %v4773_v58 = vld [vmem:[#allocation14_spill] sm:$0xff]  ;;  %s4675_s8 = scalar_lea.hbm %s4723_s3, %s3282_s4 }
  0xb3   : > { %v631_v1 = vrot.slane %v4766_v3, %v3540_v5  ;;  %v2968_v31 = vcombine.low %v2650_v16, %v2966_v37  ;;  %v2975_v54 = vrot.slane %v2967_v51, %v3540_v5  ;;  %v622_v49 = vrot.slane %v594_v14, %v3540_v5  ;;  %v1301_v9 = vpop.permute.xlu1 %1300  ;;  %v4774_v8 = vld [vmem:[#allocation18_spill] sm:$0xff]  ;;  %v4775_v51 = vld [vmem:[#allocation17_spill] sm:$0xff]  ;;  %p3400_p12 = pnand %p3399_p11, %p3529_p5  ;;  %p3407_p2 = por %p3406_p1, %p3405_p0 }
  0xb4   : > { %2680 = vrot.lane.b32.xlu1 %v2667_v7, %s3465_s6  ;;  %2674 = vrot.lane.b32.xlu0 %v2568_v41, %s3465_s6  ;;  %v2867_v34 = vrot.slane %v2860_v59, %v3540_v5  ;;  %v789_v53 = vcombine.low %v3696_v60, %v3700_v63  ;;  %v788_v16 = vcombine.low %v445_v50, %v3675_v45  ;;  %v3467_v60 = vmov 0.0   ;;  %v4780_v50 = vld [vmem:[#allocation22_spill] sm:$0xff] }
  0xb5   : > { %v2982_v11 = vrot.slane %v2968_v31, %v3540_v5  ;;  %v624_v27 = vcombine.low %v3620_v55, %v622_v49  ;;  %3294 = vmatprep.subr.mxu0 %v3467_v60  ;;  %v3022_v55 = vld [vmem:[%s4721_s1 + $0x10] sm:$0xff]  ;;  %v349_v63 = vcombine.high %v3837_v46, %v3837_v46  ;;  %3323 = vmatprep.subr.mxu1 %v3467_v60  ;;  %p3401_p13 = pneg %p3400_p12 }
  0xb6   : > { %v2868_v2 = vcombine.low %v2551_v20, %v2867_v34  ;;  %v811_v48 = vrot.slane %v789_v53, %v3540_v5  ;;  %v804_v56 = vrot.slane %v788_v16, %v3540_v5  ;;  %3295 = vmatpush3.msk.msra.mxu0 %vm3053_vm3, %v3023_v44  ;;  %v692_v30 = vcombine.low %v3871_v33, %v3875_v39  ;;  %v4781_v53 = vld [vmem:[#allocation21_spill] sm:$0xff]  ;;  %v4782_v16 = vld [vmem:[#allocation24_spill] sm:$0xff] }
  0xb7   : > { %v2983_v13 = vcombine.low %v2975_v54, %v2982_v11  ;;  %v638_v18 = vrot.slane %v624_v27, %v3540_v5  ;;  %3296 = vmatprep.subr.mxu0 %v3467_v60  ;;  %v691_v46 = vcombine.low %v349_v63, %v3852_v17  ;;  %v721_v20 = vcombine.low %v3947_v6, %v3887_v12  ;;  %v3020_v12 = vld [vmem:[%s4721_s1] sm:$0xff]  ;;  %v2985_v14 = vpop.permute.xlu1 %2984  ;;  %p3408_p3 = pnand %p3407_p2, %p3401_p13 }
  0xb8   : > { %v2876_v45 = vrot.slane %v2868_v2, %v3540_v5  ;;  %v820_v10 = vcombine.low %v811_v48, %v3738_v25  ;;  %v3021_v25 = vld [vmem:[%s4721_s1 + $0x8] sm:$0xff]  ;;  %v819_v15 = vcombine.low %v4289_v23, %v804_v56  ;;  %3297 = vmatpush3.msra.mxu0 %v3022_v55  ;;  %v720_v33 = vrot.slane %v692_v30, %v3540_v5  ;;  %v4767_v6 = vld [vmem:[#allocation13_spill] sm:$0xff]  ;;  %v4783_v48 = vld [vmem:[#allocation23_spill] sm:$0xff] }
  0xb9   : > { %2996 = vrot.lane.b32.xlu1 %v2983_v13, %s3466_s7  ;;  %v639_v40 = vcombine.low %v631_v1, %v638_v18  ;;  %v713_v17 = vrot.slane %v691_v46, %v3540_v5  ;;  %v729_v39 = vrot.slane %v721_v20, %v3540_v5  ;;  %3298 = vmatprep.subr.mxu0 %v3467_v60  ;;  %v4768_v23 = vld [vmem:[#allocation10_spill] sm:$0xff]  ;;  %v4777_v1 = vld [vmem:[#allocation9_spill] sm:$0xff]  ;;  %v4786_v56 = vld [vmem:[#allocation11_spill] sm:$0xff] }
  0xba   : > { %v2884_v24 = vcombine.low %v2876_v45, %v2883_v32  ;;  %v834_v19 = vrot.slane %v820_v10, %v3540_v5  ;;  %3302 = vmatprep.mubr.msk.f32.mxu0 %vm3468_vm5, %v3467_v60  ;;  %v643_v42 = vcombine.low %v4768_v23, %v4767_v6  ;;  %v827_v47 = vrot.slane %v819_v15, %v3540_v5  ;;  %v4778_v32 = vld [vmem:[#allocation8_spill] sm:$0xff]  ;;  %v4785_v45 = vld [vmem:[#allocation19_spill] sm:$0xff] }
  0xbb   : > { %942 = vst.msk [vmem:[#allocation2] sm:$0xff] %vm941_vm0, %v639_v40  ;;  %3299 = vmatpush3.msra.mxu0 %v3021_v25  ;;  %v4771_v35 = vcombine.low %v4769_v36, %v4770_v57  ;;  %v837_v7 = vcombine.low %v4773_v58, %v4772_v52  ;;  %v722_v62 = vcombine.low %v713_v17, %v720_v33  ;;  %v4787_v40 = vld [vmem:[#allocation25_spill] sm:$0xff] }
  0xbc   : > { %2990 = vrot.lane.b32.xlu0 %v2884_v24, %s3466_s7  ;;  %1314 = vst.msk [vmem:[#allocation2] sm:$0xff] %vm1313_vm1, %v1293_v0  ;;  %3300 = vmatprep.subr.mxu0 %v3467_v60  ;;  %v671_v61 = vrot.slane %v643_v42, %v3540_v5  ;;  %v869_v26 = vcombine.low %v4775_v51, %v4774_v8  ;;  %v4776_v0 = vld [vmem:[#allocation12_spill] sm:$0xff] }
  0xbd   : > { %v650_v21 = vrot.slane %v4771_v35, %v3540_v5  ;;  %1630 = vst.msk [vmem:[#allocation2] sm:$0xff] %vm1629_vm2, %v1609_v38  ;;  %3327 = vmatpush3.msk.msra.mxu1 %vm3053_vm3, %v3023_v44  ;;  %v835_v37 = vcombine.low %v827_v47, %v834_v19  ;;  %3301 = vmatpush3.msra.mxu0 %v3020_v12  ;;  %v4784_v38 = vld [vmem:[#allocation20_spill] sm:$0xff]  ;;  %v2299_v15 = vpop.permute.xlu0 %2298 }
  0xbe   : > { %2002 = vst.msk [vmem:[#allocation2] sm:$0xff] %vm2001_vm4, %v4474_v43  ;;  %v853_v59 = vrot.slane %v837_v7, %v3540_v5  ;;  %3324 = vmatprep.subr.mxu1 %v3467_v60  ;;  %v736_v3 = vrot.slane %v722_v62, %v3540_v5  ;;  %v673_v31 = vcombine.low %v4777_v1, %v671_v61 }
  0xbf   : > { %v672_v41 = vcombine.low %v650_v21, %v4776_v0  ;;  %2318 = vst.msk [vmem:[#allocation2] sm:$0xff] %vm2317_vm6, %v4495_v28  ;;  %v883_v54 = vrot.slane %v869_v26, %v3540_v5  ;;  %3328 = vmatpush3.msra.mxu1 %v3022_v55  ;;  %3314 = vmatprep.mubr.msk.f32.mxu1 %vm3468_vm5, %v3467_v60  ;;  %v4779_v28 = vld [vmem:[#allocation15_spill] sm:$0xff] }
  0xc0   : > { %946 = vst.msk [vmem:[#allocation2 + $0x20] sm:$0xff] %vm941_vm0, %v835_v37  ;;  %v868_v49 = vcombine.low %v4778_v32, %v853_v59  ;;  %3325 = vmatprep.subr.mxu1 %v3467_v60  ;;  %v541_v34 = vcombine.high %v4779_v28, %v4779_v28  ;;  %v886_v11 = vcombine.low %v4781_v53, %v4780_v50 }
  0xc1   : > { %2690 = vst.msk [vmem:[#allocation2] sm:$0xff] %vm2689_vm7, %v2669_v4  ;;  %v680_v43 = vrot.slane %v672_v41, %v3540_v5  ;;  %v737_v27 = vcombine.low %v729_v39, %v736_v3  ;;  %v687_v44 = vrot.slane %v673_v31, %v3540_v5  ;;  %3329 = vmatpush3.msra.mxu1 %v3021_v25 }
  0xc2   : > { %1318 = vst.msk [vmem:[#allocation2 + $0x20] sm:$0xff] %vm1313_vm1, %v1301_v9  ;;  %v918_v2 = vcombine.low %v4279_v29, %v4282_v22  ;;  %v740_v13 = vcombine.low %v4783_v48, %v4782_v16  ;;  %v876_v18 = vrot.slane %v868_v49, %v3540_v5  ;;  %3326 = vmatprep.subr.mxu1 %v3467_v60 }
  0xc3   : > { %3006 = vst.msk [vmem:[#allocation2] sm:$0xff] %vm3005_vm8, %v2985_v14  ;;  %v885_v55 = vcombine.low %v541_v34, %v4784_v38  ;;  %v902_v63 = vrot.slane %v886_v11, %v3540_v5  ;;  %v770_v10 = vcombine.low %v4786_v56, %v4785_v45  ;;  %v688_v9 = vcombine.low %v680_v43, %v687_v44 }
  0xc4   : > { %944 = vst.msk [vmem:[#allocation2 + $0x10] sm:$0xff] %vm941_vm0, %v737_v27  ;;  %3330 = vmatpush3.msra.mxu1 %v3020_v12  ;;  %v762_v29 = vrot.slane %v740_v13, %v3540_v5  ;;  %v884_v22 = vcombine.low %v876_v18, %v883_v54  ;;  %v932_v24 = vrot.slane %v918_v2, %v3540_v5  ;;  %v2305_v39 = vpop.permute.xlu1 %2304 }
  0xc5   : > { %v895_v30 = vrot.slane %v885_v55, %v3540_v5  ;;  %943 = vst.msk [vmem:[#allocation2 + $0x8] sm:$0xff] %vm941_vm0, %v688_v9  ;;  %v778_v20 = vrot.slane %v770_v10, %v3540_v5 }
  0xc6   : > { %v771_v46 = vcombine.low %v762_v29, %v4787_v40  ;;  %947 = vst.msk [vmem:[#allocation2 + $0x28] sm:$0xff] %vm941_vm0, %v884_v22 }
  0xc7   : > { %v917_v25 = vcombine.low %v895_v30, %v902_v63 }
  0xc8   : > { %v785_v19 = vrot.slane %v771_v46, %v3540_v5 }
  0xc9   : > { %v925_v17 = vrot.slane %v917_v25, %v3540_v5  ;;  %v1611_v42 = vpop.permute.xlu1 %1610 }
  0xca   : > { %v3013_v33 = vld [vmem:[#allocation2] sm:$0xff]  ;;  %v786_v12 = vcombine.low %v778_v20, %v785_v19 }
  0xcb   : > { %3303 = vmatmul.mubr.msk.f32.vlgmr.msra.gmra.mxu0 %vm3031_vm9, %v3013_v33  ;;  %v933_v6 = vcombine.low %v925_v17, %v932_v24 }
  0xcc   : > { %3305 = vmatprep.mubr.msk.f32.mxu0 %vm3468_vm5, %v3467_v60  ;;  %945 = vst.msk [vmem:[#allocation2 + $0x18] sm:$0xff] %vm941_vm0, %v786_v12  ;;  %v1297_v23 = vpop.permute.xlu0 %1296 }
  0xcd   : > { %948 = vst.msk [vmem:[#allocation2 + $0x30] sm:$0xff] %vm941_vm0, %v933_v6 }
  0xce   : > { %1316 = vst.msk [vmem:[#allocation2 + $0x10] sm:$0xff] %vm1313_vm1, %v1297_v23 }
  0xd1   : > { %v1295_v47 = vpop.permute.xlu0 %1294 }
  0xd2   : > { %1315 = vst.msk [vmem:[#allocation2 + $0x8] sm:$0xff] %vm1313_vm1, %v1295_v47 }
  0xd3   : > { %1631 = vst.msk [vmem:[#allocation2 + $0x8] sm:$0xff] %vm1629_vm2, %v1611_v42  ;;  %v1989_v5 = vpop.permute.xlu1 %1988 }
  0xd5   : > { %v1617_v36 = vpop.permute.xlu0 %1616 }
  0xd6   : > { %1634 = vst.msk [vmem:[#allocation2 + $0x20] sm:$0xff] %vm1629_vm2, %v1617_v36 }
  0xd7   : > { %2006 = vst.msk [vmem:[#allocation2 + $0x20] sm:$0xff] %vm2001_vm4, %v1989_v5 }
  0xd8   : > { %2322 = vst.msk [vmem:[#allocation2 + $0x20] sm:$0xff] %vm2317_vm6, %v2305_v39 }
  0xd9   : > { %v1983_v57 = vpop.permute.xlu0 %1982 }
  0xda   : > { %2003 = vst.msk [vmem:[#allocation2 + $0x8] sm:$0xff] %vm2001_vm4, %v1983_v57 }
  0xdb   : > { %2319 = vst.msk [vmem:[#allocation2 + $0x8] sm:$0xff] %vm2317_vm6, %v2299_v15 }
  0xdd   : > { %v1303_v35 = vpop.permute.xlu1 %1302 }
  0xde   : > { %1319 = vst.msk [vmem:[#allocation2 + $0x28] sm:$0xff] %vm1313_vm1, %v1303_v35 }
  0xe1   : > { %v2677_v21 = vpop.permute.xlu1 %2676 }
  0xe2   : > { %2694 = vst.msk [vmem:[#allocation2 + $0x20] sm:$0xff] %vm2689_vm7, %v2677_v21 }
  0xe3   : > { %v2671_v52 = vpop.permute.xlu0 %2670 }
  0xe4   : > { %2691 = vst.msk [vmem:[#allocation2 + $0x8] sm:$0xff] %vm2689_vm7, %v2671_v52 }
  0xe8   : > { %v1619_v58 = vpop.permute.xlu1 %1618 }
  0xe9   : > { %1635 = vst.msk [vmem:[#allocation2 + $0x28] sm:$0xff] %vm1629_vm2, %v1619_v58  ;;  %v1613_v7 = vpop.permute.xlu0 %1612 }
  0xea   : > { %1632 = vst.msk [vmem:[#allocation2 + $0x10] sm:$0xff] %vm1629_vm2, %v1613_v7 }
  0xed   : > { %v2993_v4 = vpop.permute.xlu1 %2992 }
  0xee   : > { %3010 = vst.msk [vmem:[#allocation2 + $0x20] sm:$0xff] %vm3005_vm8, %v2993_v4 }
  0xf1   : > { %v1991_v62 = vpop.permute.xlu1 %1990 }
  0xf2   : > { %2007 = vst.msk [vmem:[#allocation2 + $0x28] sm:$0xff] %vm2001_vm4, %v1991_v62 }
  0xf3   : > { %v2987_v61 = vpop.permute.xlu0 %2986 }
  0xf4   : > { %3007 = vst.msk [vmem:[#allocation2 + $0x8] sm:$0xff] %vm3005_vm8, %v2987_v61 }
  0xf5   : > { %v3017_v8 = vld [vmem:[#allocation2 + $0x20] sm:$0xff] }
  0xf6   : > { %3315 = vmatmul.mubr.msk.f32.vlgmr.msra.gmra.mxu1 %vm3031_vm9, %v3017_v8 }
  0xf7   : > { %3317 = vmatprep.mubr.msk.f32.mxu1 %vm3468_vm5, %v3467_v60  ;;  %v1985_v51 = vpop.permute.xlu0 %1984 }
  0xf8   : > { %2004 = vst.msk [vmem:[#allocation2 + $0x10] sm:$0xff] %vm2001_vm4, %v1985_v51 }
  0xfb   : > { %v3014_v26 = vld [vmem:[#allocation2 + $0x8] sm:$0xff] }
  0xfc   : > { %v2301_v37 = vpop.permute.xlu0 %2300  ;;  %3306 = vmatmul.mubr.msk.f32.gmra.mxu0 %vm3031_vm9, %v3014_v26 }
  0xfd   : > { %v2307_v14 = vpop.permute.xlu1 %2306  ;;  %2320 = vst.msk [vmem:[#allocation2 + $0x10] sm:$0xff] %vm2317_vm6, %v2301_v37  ;;  %3308 = vmatprep.mubr.msk.f32.mxu0 %vm3468_vm5, %v3467_v60 }
  0xfe   : > { %2323 = vst.msk [vmem:[#allocation2 + $0x28] sm:$0xff] %vm2317_vm6, %v2307_v14 }
 0x105   : > { %v1305_v0 = vpop.permute.xlu1 %1304 }
 0x106   : > { %1320 = vst.msk [vmem:[#allocation2 + $0x30] sm:$0xff] %vm1313_vm1, %v1305_v0  ;;  %v1299_v41 = vpop.permute.xlu0 %1298 }
 0x107   : > { %1317 = vst.msk [vmem:[#allocation2 + $0x18] sm:$0xff] %vm1313_vm1, %v1299_v41 }
 0x109   : > { %v2679_v59 = vpop.permute.xlu1 %2678 }
 0x10a   : > { %2695 = vst.msk [vmem:[#allocation2 + $0x28] sm:$0xff] %vm2689_vm7, %v2679_v59 }
 0x10e   : > { %v2673_v3 = vpop.permute.xlu0 %2672 }
 0x10f   : > { %2692 = vst.msk [vmem:[#allocation2 + $0x10] sm:$0xff] %vm2689_vm7, %v2673_v3  ;;  %v1621_v1 = vpop.permute.xlu1 %1620 }
 0x110   : > { %1636 = vst.msk [vmem:[#allocation2 + $0x30] sm:$0xff] %vm1629_vm2, %v1621_v1 }
 0x112   : > { %v1615_v31 = vpop.permute.xlu0 %1614 }
 0x113   : > { %1633 = vst.msk [vmem:[#allocation2 + $0x18] sm:$0xff] %vm1629_vm2, %v1615_v31 }
 0x116   : > { %v2995_v54 = vpop.permute.xlu1 %2994 }
 0x117   : > { %3011 = vst.msk [vmem:[#allocation2 + $0x28] sm:$0xff] %vm3005_vm8, %v2995_v54 }
 0x11a   : > { %v2989_v43 = vpop.permute.xlu0 %2988 }
 0x11b   : > { %3008 = vst.msk [vmem:[#allocation2 + $0x10] sm:$0xff] %vm3005_vm8, %v2989_v43 }
 0x11d   : > { %v1993_v32 = vpop.permute.xlu1 %1992 }
 0x11e   : > { %2008 = vst.msk [vmem:[#allocation2 + $0x30] sm:$0xff] %vm2001_vm4, %v1993_v32  ;;  %v1987_v49 = vpop.permute.xlu0 %1986  ;;  %v3018_v28 = vld [vmem:[#allocation2 + $0x28] sm:$0xff] }
 0x11f   : > { %2005 = vst.msk [vmem:[#allocation2 + $0x18] sm:$0xff] %vm2001_vm4, %v1987_v49  ;;  %3318 = vmatmul.mubr.msk.f32.gmra.mxu1 %vm3031_vm9, %v3018_v28 }
 0x120   : > { %3320 = vmatprep.mubr.msk.f32.mxu1 %vm3468_vm5, %v3467_v60 }
 0x122   : > { %v2309_v34 = vpop.permute.xlu1 %2308  ;;  %v2303_v50 = vpop.permute.xlu0 %2302  ;;  %v3015_v53 = vld [vmem:[#allocation2 + $0x10] sm:$0xff] }
 0x123   : > { %2324 = vst.msk [vmem:[#allocation2 + $0x30] sm:$0xff] %vm2317_vm6, %v2309_v34  ;;  %2321 = vst.msk [vmem:[#allocation2 + $0x18] sm:$0xff] %vm2317_vm6, %v2303_v50  ;;  %3309 = vmatmul.mubr.msk.f32.gmra.mxu0 %vm3031_vm9, %v3015_v53 }
 0x124   : > { %3311 = vmatprep.mubr.msk.f32.mxu0 %vm3468_vm5, %v3467_v60  ;;  %v3270_v60 = vld [vmem:[%s4722_s2] ss:$0 sm:$0xff] }
 0x126   : > { %v2681_v11 = vpop.permute.xlu1 %2680  ;;  %v2675_v27 = vpop.permute.xlu0 %2674 }
 0x127   : > { %2696 = vst.msk [vmem:[#allocation2 + $0x30] sm:$0xff] %vm2689_vm7, %v2681_v11  ;;  %2693 = vst.msk [vmem:[#allocation2 + $0x18] sm:$0xff] %vm2689_vm7, %v2675_v27 }
 0x12b   : > { %v2997_v44 = vpop.permute.xlu1 %2996 }
 0x12c   : > { %3012 = vst.msk [vmem:[#allocation2 + $0x30] sm:$0xff] %vm3005_vm8, %v2997_v44 }
 0x12e   : > { %v2991_v2 = vpop.permute.xlu0 %2990 }
 0x12f   : > { %3009 = vst.msk [vmem:[#allocation2 + $0x18] sm:$0xff] %vm3005_vm8, %v2991_v2 }
 0x133   : > { %v3019_v16 = vld [vmem:[#allocation2 + $0x30] sm:$0xff] }
 0x134   : > { %3321 = vmatmul.mubr.msk.f32.gmra.mxu1 %vm3031_vm9, %v3019_v16 }
 0x136   : > { %v3016_v48 = vld [vmem:[#allocation2 + $0x18] sm:$0xff] }
 0x137   : > { %3312 = vmatmul.mubr.msk.f32.gmra.mxu0 %vm3031_vm9, %v3016_v48 }
 0x18b   : > { %v3123_v13 = vpop.f32.mrf.mxu0 }
 0x18c   : > { %v3124_v18 = vadd.f32 %v3270_v60, %v3123_v13 }
 0x18d   : > { %v3304_v38 = vpop.f32.mrf.mxu0 }
 0x18e   : > { %3157 = vst [vmem:[%s166_s29] sm:$0xff] %v3124_v18 }
 0x1b6   : > { %v3143_v55 = vpop.f32.mrf.mxu1 }
 0x1b7   : > { %v3144_v63 = vadd.f32 %v3270_v60, %v3143_v55 }
 0x1b8   : > { %v3316_v45 = vpop.f32.mrf.mxu1 }
 0x1b9   : > { %3161 = vst [vmem:[%s166_s29 + $0x20] sm:$0xff] %v3144_v63 }
 0x1bc   : > { %v3128_v56 = vpop.f32.mrf.mxu0 }
 0x1bd   : > { %v3129_v10 = vadd.f32 %v3270_v60, %v3128_v56 }
 0x1be   : > { %v3307_v9 = vpop.f32.mrf.mxu0 }
 0x1bf   : > { %3158 = vst [vmem:[%s166_s29 + $0x8] sm:$0xff] %v3129_v10 }
 0x1df   : > { %v3148_v29 = vpop.f32.mrf.mxu1 }
 0x1e0   : > { %v3149_v22 = vadd.f32 %v3270_v60, %v3148_v29 }
 0x1e1   : > { %v3319_v30 = vpop.f32.mrf.mxu1 }
 0x1e2   : > { %3162 = vst [vmem:[%s166_s29 + $0x28] sm:$0xff] %v3149_v22 }
 0x1e3   : > { %v3133_v40 = vpop.f32.mrf.mxu0 }
 0x1e4   : > { %v3134_v46 = vadd.f32 %v3270_v60, %v3133_v40 }
 0x1e5   : > { %v3310_v20 = vpop.f32.mrf.mxu0 }
 0x1e6   : > { %3159 = vst [vmem:[%s166_s29 + $0x10] sm:$0xff] %v3134_v46 }
 0x1f4   : > { %v3153_v25 = vpop.f32.mrf.mxu1 }
 0x1f5   : > { %v3154_v24 = vadd.f32 %v3270_v60, %v3153_v25 }
 0x1f6   : > { %v3322_v15 = vpop.f32.mrf.mxu1 }
 0x1f7   : > { %v3138_v19 = vpop.f32.mrf.mxu0  ;;  %3163 = vst [vmem:[%s166_s29 + $0x30] sm:$0xff] %v3154_v24 }
 0x1f8   : > { %v3139_v33 = vadd.f32 %v3270_v60, %v3138_v19 }
 0x1f9   : > { %v3313_v17 = vpop.f32.mrf.mxu0 }
 0x1fa   : > { %3160 = vst [vmem:[%s166_s29 + $0x18] sm:$0xff] %v3139_v33 }
 0x1fb   : > { %3411 = shalt.err (!%p3408_p3)
}
 0x1fc   : > { %s3412_s19 = scalar_lea.hbm %s4675_s8, 896  ;;  %s3416_s25 = scalar_lea.hbm %s4723_s3, 3584 }
 0x1fd   : > { %p3413_p4 = scmp.ne.s32.totalorder %s4675_s8, %s3412_s19  ;;  %p3417_p9 = scmp.lt.s32.totalorder %s4675_s8, %s4723_s3 }
 0x1fe   : > { %p3418_p10 = scmp.lt.s32.totalorder %s3416_s25, %s3412_s19 }
 0x1ff   : > { %p3414_p7 = pnand %p3413_p4, %p3529_p5 }
 0x200   : > { %p3419_p11 = por %p3418_p10, %p3417_p9 }
 0x201   : > { %p3415_p8 = pneg %p3414_p7 }
 0x203   : > { %p3420_p12 = pnand %p3419_p11, %p3415_p8 }
 0x205   : > { %3423 = shalt.err (!%p3420_p12)
}
 0x206   : > { %s3470_s28 = smov 128  }
 0x207   : > { %3333 = dma.vmem_to_hbm [thread:$0]  (%p3529_p5), %s4670_s30, 896, %s4675_s8, %s4679_s9, %s3470_s28, %s3470_s28, %s3464_s5  }
 0x208 PF: > { %p3339_p13 = scmp.ge.s32.totalorder %s3458_s15, 2  ;;  %s3193_s29 = sand.u32 1, %s3446_s12  }
 0x209   : > { %s3194_s4 = scalar_lea.sflag [#allocation4], %s3193_s29 }
 0x20a   : > { %p3336_p0 = pnand %p3339_p13, %p3533_p6 }
 0x20c   : > { %p3337_p1 = pneg %p3336_p0 }
 0x20e   : > { %3441 = dma.done.wait (%p3337_p1), %s3194_s4, 896  }
 0x20f   : > { %3443 = vsyncadd (%p3337_p1), %s3194_s4, 4294966400  ;;  %p13_p2 = scmp.ge.s32.totalorder %s3516_s18, 6   ;;  %s4788_s12 = smov %s3450_s13 }
 0x210   : > { %s4789_s13 = smov %s3454_s14  ;;  %s4790_s14 = smov %s3527_s21 }
 0x211   : > { %s4791_s15 = smov %s3516_s18  ;;  %15 = sbr.rel (!%p13_p2) target bundleno = 3 (0x3), region = 67 }
 0x216   :  { %3199 = vsyncpa [#allocation4], 1 }
 0x217   :  { %3201 = vsyncpa [#allocation4 + $0x1], 1 }

</bundles_post_ra>
